<compile_context>
chip_gen: v7x
topology: tpu7x:2x2x1
jax: 0.10.0
libtpu: 0.0.40
codegen_flags: <defaults>
</compile_context>

<pallas_src>
import jax
import jax.numpy as jnp
from jax.experimental import pallas as pl
from jax.experimental.pallas import tpu as pltpu


def autoencoder_kernel(x_ref, w0_ref, w_ref, b_ref, o_ref):
    """Whole (fused) encoder+decoder chain for one batch tile, weights VMEM-resident.

    x_ref : (bt, D)          f32  raw activations (cast to bf16 in-kernel)
    w0_ref: (D, Dp)          bf16 first layer weight (unpadded rows)
    w_ref : (4, Dp, Dp)      bf16 fused layers F1..F4, zero-padded, (in, out) layout
    b_ref : (5, Dp)          f32  biases for F0..F4, zero-padded
    o_ref : (bt, Dp)         bf16 lane-dense output (cols D..Dp are exact zeros)
    """
    # F0: D -> 128, ReLU. bf16 operands, f32 MXU accumulation.
    h32 = jnp.dot(x_ref[...].astype(jnp.bfloat16), w0_ref[...],
                  preferred_element_type=jnp.float32)
    h = jnp.maximum(h32 + b_ref[0:1, :], 0.0).astype(jnp.bfloat16)

    # F1: 128->64 ReLU, F2(fused 64->32->64): ReLU, F3: 64->128 ReLU, F4: 128->D (no ReLU)
    for layer in range(4):
        acc = jnp.dot(h, w_ref[layer], preferred_element_type=jnp.float32)
        acc = acc + b_ref[layer + 1:layer + 2, :]
        if layer == 3:
            o_ref[...] = acc.astype(o_ref.dtype)          # final layer: bf16 store, no ReLU
        else:
            h = jnp.maximum(acc, 0.0).astype(jnp.bfloat16)


def init_params(key, input_dim):
    """Deterministic PyTorch-Linear-style init (uniform +-1/sqrt(fan_in)), (in, out) layout."""
    dims = [(input_dim, 128), (128, 64), (64, 32),
            (32, 64), (64, 128), (128, input_dim)]
    params = []
    keys = jax.random.split(key, 2 * len(dims))
    for i, (din, dout) in enumerate(dims):
        bound = 1.0 / (din ** 0.5)
        w = jax.random.uniform(keys[2 * i], (din, dout), jnp.float32, -bound, bound)
        b = jax.random.uniform(keys[2 * i + 1], (1, dout), jnp.float32, -bound, bound)
        params.append((w, b))
    return params


def _pad_to(a, shape):
    pads = [(0, s - d) for d, s in zip(a.shape, shape)]
    return jnp.pad(a, pads)


def pack_params(params, d_pad):
    """Fuse layers 2&3 (no ReLU between) and pack into slabs.

    Returns:
      w0_bf : (D, d_pad)        bf16
      w_slab: (4, d_pad, d_pad) bf16   [F1: 128->64, F23: 64->64, F3: 64->128, F4: 128->D]
      b_slab: (5, d_pad)        f32    [b0, b1, b23, b4, b5]
    """
    (w0, b0), (w1, b1), (w2, b2), (w3, b3), (w4, b4), (w5, b5) = params
    w23 = w2 @ w3                     # (64, 64) in f32 at pack time
    b23 = b2 @ w3 + b3                # (1, 64)
    fused = [(w1, b1), (w23, b23), (w4, b4), (w5, b5)]

    w0_bf = _pad_to(w0, (w0.shape[0], d_pad)).astype(jnp.bfloat16)
    w_slab = jnp.stack([_pad_to(w, (d_pad, d_pad)) for w, _ in fused]).astype(jnp.bfloat16)
    biases = [b0] + [b for _, b in fused]
    b_slab = jnp.stack([_pad_to(b.reshape(-1), (d_pad,)) for b in biases]).astype(jnp.float32)
    return w0_bf, w_slab, b_slab


def autoencoder_forward(x, params, *, batch_tile=512):
    """Returns bf16 reconstruction (B, D). Padded rows/cols are computed then discarded."""
    B, D = x.shape
    d_pad = max(128, pl.cdiv(D, 128) * 128)         # lane-dense hidden/output width
    b_pad = pl.cdiv(B, batch_tile) * batch_tile     # ragged batch -> minimal zero pad

    if b_pad != B:                                  # only materialize a pad when needed
        x = jnp.pad(x, ((0, b_pad - B), (0, 0)))

    w0_bf, w_slab, b_slab = pack_params(params, d_pad)

    grid = (b_pad // batch_tile,)
    in_specs = [
        pl.BlockSpec((batch_tile, D), lambda i: (i, 0)),            # x: tiled over batch, raw f32
        pl.BlockSpec(w0_bf.shape, lambda i: (0, 0)),                # first-layer weight (invariant)
        pl.BlockSpec(w_slab.shape, lambda i: (0, 0, 0)),            # fused weight slab (invariant)
        pl.BlockSpec(b_slab.shape, lambda i: (0, 0)),               # bias slab (invariant)
    ]
    out_spec = pl.BlockSpec((batch_tile, d_pad), lambda i: (i, 0))

    out_p = pl.pallas_call(
        autoencoder_kernel,
        out_shape=jax.ShapeDtypeStruct((b_pad, d_pad), jnp.bfloat16),   # bf16 writeback
        grid_spec=pltpu.PrefetchScalarGridSpec(
            num_scalar_prefetch=0,
            grid=grid,
            in_specs=in_specs,
            out_specs=out_spec,
        ),
        compiler_params=pltpu.CompilerParams(
            dimension_semantics=("parallel",),      # shard batch tiles across TCs (v7x)
            vmem_limit_bytes=32 * 1024 * 1024,      # tiny footprint; safe on v5e/v6e/v7x
        ),
    )(x, w0_bf, w_slab, b_slab)

    return out_p[:B, :D]


def autoencoder_ref(x, params):
    h = x
    for li, (w, b) in enumerate(params):
        h = h @ w + b
        # ReLU after every layer except the 32-wide encoder output (idx 2) and final (idx 5)
        if li not in (2, 5):
            h = jnp.maximum(h, 0.0)
    return h


if __name__ == "__main__":
    key = jax.random.PRNGKey(0)
    kx, kp = jax.random.split(key)

    input_dim = 64
    batch = 2048                    # grid of 4 batch tiles of 512 (>=2 steps per v7x TC)
    x = jax.random.normal(kx, (batch, input_dim), dtype=jnp.float32)
    params = init_params(kp, input_dim)

    out = autoencoder_forward(x, params, batch_tile=512)
    out = jax.block_until_ready(out)

    ref = autoencoder_ref(x, params)
    assert out.shape == (batch, input_dim)
    assert out.dtype == jnp.bfloat16
    # bf16 operands/output with f32 MXU accumulation -> relaxed tolerance vs f32 reference.
    assert jnp.allclose(out.astype(jnp.float32), ref, atol=5e-2, rtol=5e-2)

    print("KERNEL_OK")
</pallas_src>

<mosaic_0001>
module attributes {stable_mosaic.version = 11 : i64} {
  func.func @autoencoder_kernel(%arg0: i32, %arg1: memref<512x64xf32, #tpu.memory_space<vmem>>, %arg2: memref<64x128xbf16, #tpu.memory_space<vmem>>, %arg3: memref<4x128x128xbf16, #tpu.memory_space<vmem>>, %arg4: memref<5x128xf32, #tpu.memory_space<vmem>>, %arg5: memref<512x128xbf16, #tpu.memory_space<vmem>>) attributes {dimension_semantics = [#tpu.dimension_semantics<parallel>], iteration_bounds = array<i64: 4>, scalar_prefetch = 0 : i64, scratch_operands = 0 : i64, tpu.core_type = #tpu.core_type<tc>, window_params = [{transform_indices = @transform_0, window_bounds = array<i64: 512, 64>}, {pipeline_mode = #tpu.pipeline_mode<synchronous>, transform_indices = @transform_1, window_bounds = array<i64: 64, 128>}, {pipeline_mode = #tpu.pipeline_mode<synchronous>, transform_indices = @transform_2, window_bounds = array<i64: 4, 128, 128>}, {pipeline_mode = #tpu.pipeline_mode<synchronous>, transform_indices = @transform_3, window_bounds = array<i64: 5, 128>}, {transform_indices = @transform_4, window_bounds = array<i64: 512, 128>}]} {
    %c0 = arith.constant 0 : index
    %c0_0 = arith.constant 0 : index
    %0 = vector.load %arg1[%c0, %c0_0] : memref<512x64xf32, #tpu.memory_space<vmem>>, vector<512x64xf32>
    %1 = arith.truncf %0 : vector<512x64xf32> to vector<512x64xbf16>
    %c0_1 = arith.constant 0 : index
    %c0_2 = arith.constant 0 : index
    %2 = vector.load %arg2[%c0_1, %c0_2] : memref<64x128xbf16, #tpu.memory_space<vmem>>, vector<64x128xbf16>
    %cst = arith.constant dense<0.000000e+00> : vector<512x128xf32>
    %3 = tpu.matmul %1, %2, %cst {dimension_numbers = #tpu.dot_dimension_numbers<[1], [0], [0], [1], [0, 0, 1, 1], [], []>} : vector<512x64xbf16>, vector<64x128xbf16>, vector<512x128xf32> -> vector<512x128xf32>
    %c0_3 = arith.constant 0 : index
    %c0_4 = arith.constant 0 : index
    %4 = vector.load %arg4[%c0_3, %c0_4] : memref<5x128xf32, #tpu.memory_space<vmem>>, vector<1x128xf32>
    %5 = vector.broadcast %4 : vector<1x128xf32> to vector<512x128xf32>
    %6 = arith.addf %3, %5 : vector<512x128xf32>
    %cst_5 = arith.constant 0.000000e+00 : f32
    %7 = vector.broadcast %cst_5 : f32 to vector<512x128xf32>
    %8 = arith.maximumf %6, %7 : vector<512x128xf32>
    %9 = arith.truncf %8 : vector<512x128xf32> to vector<512x128xbf16>
    %c0_6 = arith.constant 0 : index
    %c0_7 = arith.constant 0 : index
    %c0_8 = arith.constant 0 : index
    %10 = vector.load %arg3[%c0_6, %c0_7, %c0_8] : memref<4x128x128xbf16, #tpu.memory_space<vmem>>, vector<1x128x128xbf16>
    %11 = vector.shape_cast %10 : vector<1x128x128xbf16> to vector<128x128xbf16>
    %cst_9 = arith.constant dense<0.000000e+00> : vector<512x128xf32>
    %12 = tpu.matmul %9, %11, %cst_9 {dimension_numbers = #tpu.dot_dimension_numbers<[1], [0], [0], [1], [0, 0, 1, 1], [], []>} : vector<512x128xbf16>, vector<128x128xbf16>, vector<512x128xf32> -> vector<512x128xf32>
    %c1 = arith.constant 1 : index
    %c0_10 = arith.constant 0 : index
    %13 = vector.load %arg4[%c1, %c0_10] : memref<5x128xf32, #tpu.memory_space<vmem>>, vector<1x128xf32>
    %14 = vector.broadcast %13 : vector<1x128xf32> to vector<512x128xf32>
    %15 = arith.addf %12, %14 : vector<512x128xf32>
    %cst_11 = arith.constant 0.000000e+00 : f32
    %16 = vector.broadcast %cst_11 : f32 to vector<512x128xf32>
    %17 = arith.maximumf %15, %16 : vector<512x128xf32>
    %18 = arith.truncf %17 : vector<512x128xf32> to vector<512x128xbf16>
    %c1_12 = arith.constant 1 : index
    %c0_13 = arith.constant 0 : index
    %c0_14 = arith.constant 0 : index
    %19 = vector.load %arg3[%c1_12, %c0_13, %c0_14] : memref<4x128x128xbf16, #tpu.memory_space<vmem>>, vector<1x128x128xbf16>
    %20 = vector.shape_cast %19 : vector<1x128x128xbf16> to vector<128x128xbf16>
    %cst_15 = arith.constant dense<0.000000e+00> : vector<512x128xf32>
    %21 = tpu.matmul %18, %20, %cst_15 {dimension_numbers = #tpu.dot_dimension_numbers<[1], [0], [0], [1], [0, 0, 1, 1], [], []>} : vector<512x128xbf16>, vector<128x128xbf16>, vector<512x128xf32> -> vector<512x128xf32>
    %c2 = arith.constant 2 : index
    %c0_16 = arith.constant 0 : index
    %22 = vector.load %arg4[%c2, %c0_16] : memref<5x128xf32, #tpu.memory_space<vmem>>, vector<1x128xf32>
    %23 = vector.broadcast %22 : vector<1x128xf32> to vector<512x128xf32>
    %24 = arith.addf %21, %23 : vector<512x128xf32>
    %cst_17 = arith.constant 0.000000e+00 : f32
    %25 = vector.broadcast %cst_17 : f32 to vector<512x128xf32>
    %26 = arith.maximumf %24, %25 : vector<512x128xf32>
    %27 = arith.truncf %26 : vector<512x128xf32> to vector<512x128xbf16>
    %c2_18 = arith.constant 2 : index
    %c0_19 = arith.constant 0 : index
    %c0_20 = arith.constant 0 : index
    %28 = vector.load %arg3[%c2_18, %c0_19, %c0_20] : memref<4x128x128xbf16, #tpu.memory_space<vmem>>, vector<1x128x128xbf16>
    %29 = vector.shape_cast %28 : vector<1x128x128xbf16> to vector<128x128xbf16>
    %cst_21 = arith.constant dense<0.000000e+00> : vector<512x128xf32>
    %30 = tpu.matmul %27, %29, %cst_21 {dimension_numbers = #tpu.dot_dimension_numbers<[1], [0], [0], [1], [0, 0, 1, 1], [], []>} : vector<512x128xbf16>, vector<128x128xbf16>, vector<512x128xf32> -> vector<512x128xf32>
    %c3 = arith.constant 3 : index
    %c0_22 = arith.constant 0 : index
    %31 = vector.load %arg4[%c3, %c0_22] : memref<5x128xf32, #tpu.memory_space<vmem>>, vector<1x128xf32>
    %32 = vector.broadcast %31 : vector<1x128xf32> to vector<512x128xf32>
    %33 = arith.addf %30, %32 : vector<512x128xf32>
    %cst_23 = arith.constant 0.000000e+00 : f32
    %34 = vector.broadcast %cst_23 : f32 to vector<512x128xf32>
    %35 = arith.maximumf %33, %34 : vector<512x128xf32>
    %36 = arith.truncf %35 : vector<512x128xf32> to vector<512x128xbf16>
    %c3_24 = arith.constant 3 : index
    %c0_25 = arith.constant 0 : index
    %c0_26 = arith.constant 0 : index
    %37 = vector.load %arg3[%c3_24, %c0_25, %c0_26] : memref<4x128x128xbf16, #tpu.memory_space<vmem>>, vector<1x128x128xbf16>
    %38 = vector.shape_cast %37 : vector<1x128x128xbf16> to vector<128x128xbf16>
    %cst_27 = arith.constant dense<0.000000e+00> : vector<512x128xf32>
    %39 = tpu.matmul %36, %38, %cst_27 {dimension_numbers = #tpu.dot_dimension_numbers<[1], [0], [0], [1], [0, 0, 1, 1], [], []>} : vector<512x128xbf16>, vector<128x128xbf16>, vector<512x128xf32> -> vector<512x128xf32>
    %c4 = arith.constant 4 : index
    %c0_28 = arith.constant 0 : index
    %40 = vector.load %arg4[%c4, %c0_28] : memref<5x128xf32, #tpu.memory_space<vmem>>, vector<1x128xf32>
    %41 = vector.broadcast %40 : vector<1x128xf32> to vector<512x128xf32>
    %42 = arith.addf %39, %41 : vector<512x128xf32>
    %43 = arith.truncf %42 : vector<512x128xf32> to vector<512x128xbf16>
    %c0_29 = arith.constant 0 : index
    %c0_30 = arith.constant 0 : index
    %44 = vector.load %arg5[%c0_29, %c0_30] : memref<512x128xbf16, #tpu.memory_space<vmem>>, vector<512x128xbf16>
    tpu.vector_store %arg5[%c0_29, %c0_30], %43 {strides = array<i32>} : memref<512x128xbf16, #tpu.memory_space<vmem>>, vector<512x128xbf16>,
    return
  }
  func.func @transform_0(%arg0: i32) -> (i32, i32) {
    %c0_i32 = arith.constant 0 : i32
    %c0_i32_0 = arith.constant 0 : i32
    return %arg0, %c0_i32 : i32, i32
  }
  func.func @transform_1(%arg0: i32) -> (i32, i32) {
    %c0_i32 = arith.constant 0 : i32
    %c0_i32_0 = arith.constant 0 : i32
    %c0_i32_1 = arith.constant 0 : i32
    return %c0_i32, %c0_i32_0 : i32, i32
  }
  func.func @transform_2(%arg0: i32) -> (i32, i32, i32) {
    %c0_i32 = arith.constant 0 : i32
    %c0_i32_0 = arith.constant 0 : i32
    %c0_i32_1 = arith.constant 0 : i32
    %c0_i32_2 = arith.constant 0 : i32
    return %c0_i32, %c0_i32_0, %c0_i32_1 : i32, i32, i32
  }
  func.func @transform_3(%arg0: i32) -> (i32, i32) {
    %c0_i32 = arith.constant 0 : i32
    %c0_i32_0 = arith.constant 0 : i32
    %c0_i32_1 = arith.constant 0 : i32
    return %c0_i32, %c0_i32_0 : i32, i32
  }
  func.func @transform_4(%arg0: i32) -> (i32, i32) {
    %c0_i32 = arith.constant 0 : i32
    %c0_i32_0 = arith.constant 0 : i32
    return %arg0, %c0_i32 : i32, i32
  }
}

</mosaic_0001>

<bundles_post_ra>
// kernel: tpu_custom_call.1
= control target key start
LH: loop header
LB: loop body
LE: loop exit
PB: predicated region body
PF: predicated region fallthrough
CT: control target
= control target key end

     0   :  { %9 = vsyncpa [#allocation3], 0  ;;  %s4880_s0 = inlined_call_operand.vmem [shape: f32[2048,64], index: 0, kind: input, shape index: {}]   ;;  %s4881_s1 = inlined_call_operand.vmem [shape: bf16[64,128], index: 1, kind: input, shape index: {}]   ;;  %s4882_s2 = inlined_call_operand.vmem [shape: bf16[4,128,128], index: 2, kind: input, shape index: {}]   ;;  %s4883_s3 = inlined_call_operand.vmem [shape: f32[5,128], index: 3, kind: input, shape index: {}]   ;;  %s4884_s4 = inlined_call_operand.hbm [shape: bf16[2048,128], index: 4, kind: output, shape index: {}]  }
   0x1   :  { %11 = vsyncpa [#allocation3 + $0x1], 0  ;;  %s4152_s15 = smov 0   ;;  %s4154_s16 = smov 0  }
   0x2   :  { %s4156_s17 = smov 0   ;;  %s4158_s18 = smov 0  }
   0x3 LB: > { %s4173_s19 = sadd.s32 4294967295, %s4122_s18   ;;  %s2934_s20 = sadd.s32 4294967294, %s4122_s18   ;;  %s4122_s18 = sphi %s4158_s18, %s4890_s18   ;;  %s4118_s17 = sphi %s4156_s17, %s4889_s17   ;;  %s4114_s16 = sphi %s4154_s16, %s4888_s16   ;;  %s4110_s15 = sphi %s4152_s15, %s4887_s15  }
   0x4   : > { %s4177_s21 = sadd.s32 1, %s4122_s18   ;;  %s113_s22 = sadd.s32 1, %s4118_s17 }
   0x5   : > { %s110_s23 = ssub.s32 %s4122_s18, %s4177_s21  ;;  %p123_p0 = scmp.ne.s32.totalorder %s4118_s17, %s4114_s16 }
   0x6   : > { %p111_p1 = scmp.eq.s32.totalorder %s110_s23, 0  ;;  %p124_p2 = scmp.eq.s32.totalorder %s4173_s19, 3 }
   0x7   : > { %p129_p3 = scmp.ne.s32.totalorder %s4114_s16, %s4110_s15  ;;  %p130_p4 = scmp.eq.s32.totalorder %s2934_s20, 3 }
   0x8   : > { %s4188_s24 = scalar_select %p111_p1, %s4118_s17, %s113_s22  }
   0x9   : > { %p4190_p5 = por %p124_p2, %p123_p0  ;;  %p4194_p6 = por %p130_p4, %p129_p3 }
   0xa   : > { %p2937_p7 = scmp.ge.s32.totalorder %s4122_s18, 1  ;;  %p166_p8 = scmp.lt.s32.totalorder %s4122_s18, 5 }
   0xc   : > { %p167_p9 = pnand %p2937_p7, %p166_p8 }
   0xd   : > { %v4024_v0 = vld [vmem:[%s4881_s1] sm:$0xff] (!%p167_p9)   ;;  %s2939_s29 = sshll.u32 (!%p167_p9), %s4173_s19, 6  ;;  %v4025_v1 = vld [vmem:[%s4881_s1 + $0x8] sm:$0xff] (!%p167_p9)   ;;  %v4026_v2 = vld [vmem:[%s4881_s1 + $0x10] sm:$0xff] (!%p167_p9)   ;;  %vm333_vm0 = vcmask (!%p167_p9), 523264   ;;  %s189_s27 = sand.u32 (!%p167_p9), 1, %s4114_s16  }
   0xe   : > { %170 = sbr.rel (%p167_p9) target bundleno = 1272 (0x4f8), region = 36  ;;  %p193_p10 = scmp.lt.s32.totalorder (!%p167_p9), %s2939_s29, 255  ;;  %3583 = vmatprep.subr.bf16.mxu0 (!%p167_p9), %v4024_v0  ;;  %3975 = vmatprep.subr.bf16.mxu1 (!%p167_p9), %v4024_v0  ;;  %v4027_v5 = vld [vmem:[%s4881_s1 + $0x18] sm:$0xff] (!%p167_p9)   ;;  %v4028_v11 = vld [vmem:[%s4882_s2] sm:$0xff] (!%p167_p9)   ;;  %v4029_v27 = vld [vmem:[%s4882_s2 + $0x8] sm:$0xff] (!%p167_p9)  }
   0xf   : > { %3584 = vmatpush3.bf16.msra.mxu0 (!%p167_p9), %v4024_v0  ;;  %3979 = vmatpush3.bf16.msra.mxu1 (!%p167_p9), %v4024_v0  ;;  %v4030_v34 = vld [vmem:[%s4882_s2 + $0x10] sm:$0xff] (!%p167_p9)   ;;  %v4031_v43 = vld [vmem:[%s4882_s2 + $0x18] sm:$0xff] (!%p167_p9)   ;;  %v4032_v48 = vld [vmem:[%s4882_s2 + $0x20] sm:$0xff] (!%p167_p9)   ;;  %s2938_s30 = sshll.u32 (!%p167_p9), %s189_s27, 8  ;;  %s3195_s6 = sshll.u32 (!%p167_p9), %s4173_s19, 12 }
  0x10   : > { %3585 = vmatprep.subr.bf16.mxu0 (!%p167_p9), %v4025_v1  ;;  %3976 = vmatprep.subr.bf16.mxu1 (!%p167_p9), %v4025_v1  ;;  %v4033_v54 = vld [vmem:[%s4882_s2 + $0x28] sm:$0xff] (!%p167_p9)   ;;  %v4034_v61 = vld [vmem:[%s4882_s2 + $0x30] sm:$0xff] (!%p167_p9)   ;;  %s4734_s5 = scalar_lea.vmem (!%p167_p9), [#allocation2], %s2938_s30  ;;  %s4831_s10 = scalar_lea.hbm (!%p167_p9), %s4884_s4, %s3195_s6 }
  0x11   : > { %s2872_s7 = sshll.u32 (!%p167_p9), %s4734_s5, 4  ;;  %s4839_s19 = scalar_lea.sflag (!%p167_p9), [#allocation3], %s189_s27  ;;  %s4833_s7 = int_to_ptr.vmem [resolvable:$true] %s2872_s7 }
  0x12   : > { %s4060_s12 = scalar_lea.vmem (!%p167_p9), %s4833_s7, 4096  ;;  %s4124_s13 = smov (!%p167_p9), [#allocation2]  }
  0x13   : > { %3586 = vmatpush3.bf16.msra.mxu0 (!%p167_p9), %v4025_v1  ;;  %3980 = vmatpush3.bf16.msra.mxu1 (!%p167_p9), %v4025_v1  ;;  %p4061_p11 = scmp.ne.s32.totalorder (!%p167_p9), %s4833_s7, %s4060_s12  ;;  %s4064_s14 = sshll.u32 (!%p167_p9), %s4124_s13, 4  ;;  %s4065_s14 = int_to_ptr.vmem [resolvable:$false] %s4064_s14 }
  0x14   : > { %3587 = vmatprep.subr.bf16.mxu0 (!%p167_p9), %v4026_v2  ;;  %3977 = vmatprep.subr.bf16.mxu1 (!%p167_p9), %v4026_v2  ;;  %s4066_s20 = scalar_lea.vmem (!%p167_p9), %s4065_s14, 8192  ;;  %p4067_p0 = scmp.lt.s32.totalorder (!%p167_p9), %s4833_s7, %s4065_s14 }
  0x15   : > { %s4892_s29 = smov (!%p193_p10, %s2939_s29), 255  ;;  %p4062_p12 = pnand %p4061_p11, %p4190_p5 }
  0x16   : > { %s2940_s8 = sshll.u32 %s4892_s29, 3  ;;  %p4068_p1 = scmp.lt.s32.totalorder %s4066_s20, %s4060_s12 }
  0x17   : > { %s4213_s11 = scalar_lea.vmem %s4880_s0, %s2940_s8  ;;  %3588 = vmatpush3.bf16.msra.mxu0 %v4026_v2  ;;  %3981 = vmatpush3.bf16.msra.mxu1 %v4026_v2  ;;  %p4063_p13 = pneg %p4062_p12 }
  0x18   : > { %v200_v3 = vld [vmem:[%s4213_s11] sm:$0xff]  ;;  %v201_v4 = vld [vmem:[%s4213_s11 + $0x8] sm:$0xff]  ;;  %v202_v7 = vld [vmem:[%s4213_s11 + $0x10] sm:$0xff]  ;;  %3589 = vmatprep.subr.bf16.mxu0 %v4027_v5  ;;  %3978 = vmatprep.subr.bf16.mxu1 %v4027_v5  ;;  %p4069_p2 = por %p4068_p1, %p4067_p0 }
  0x19   : > { %v264_v6 = vpack.c.bf16 %v201_v4, %v200_v3  ;;  %v203_v8 = vld [vmem:[%s4213_s11 + $0x18] sm:$0xff]  ;;  %v204_v9 = vld [vmem:[%s4213_s11 + $0x20] sm:$0xff]  ;;  %v205_v10 = vld [vmem:[%s4213_s11 + $0x28] sm:$0xff] }
  0x1a   : > { %v265_v12 = vpack.c.bf16 %v203_v8, %v202_v7  ;;  %v266_v13 = vpack.c.bf16 %v205_v10, %v204_v9  ;;  %v206_v14 = vld [vmem:[%s4213_s11 + $0x30] sm:$0xff]  ;;  %v232_v15 = vld [vmem:[%s4213_s11 + $0x100] sm:$0xff]  ;;  %v233_v16 = vld [vmem:[%s4213_s11 + $0x108] sm:$0xff]  ;;  %p4070_p3 = pnand %p4069_p2, %p4063_p13 }
  0x1b   : > { %3591 = vmatprep.mubr.msk.bf16.mxu0 %vm333_vm0, %v264_v6  ;;  %3590 = vmatpush3.bf16.msra.mxu0 %v4027_v5  ;;  %v234_v17 = vld [vmem:[%s4213_s11 + $0x110] sm:$0xff]  ;;  %v235_v18 = vld [vmem:[%s4213_s11 + $0x118] sm:$0xff]  ;;  %v280_v20 = vpack.c.bf16 %v233_v16, %v232_v15  ;;  %v236_v22 = vld [vmem:[%s4213_s11 + $0x120] sm:$0xff] }
  0x1c   : > { %3982 = vmatpush3.bf16.msra.mxu1 %v4027_v5  ;;  %v207_v19 = vld [vmem:[%s4213_s11 + $0x38] sm:$0xff]  ;;  %v281_v21 = vpack.c.bf16 %v235_v18, %v234_v17  ;;  %v237_v23 = vld [vmem:[%s4213_s11 + $0x128] sm:$0xff]  ;;  %v208_v24 = vld [vmem:[%s4213_s11 + $0x40] sm:$0xff] }
  0x1d   : > { %3655 = vmatprep.subr.bf16.mxu1 %v4028_v11  ;;  %v209_v25 = vld [vmem:[%s4213_s11 + $0x48] sm:$0xff]  ;;  %v282_v26 = vpack.c.bf16 %v237_v23, %v236_v22  ;;  %3623 = vmatprep.mubr.msk.bf16.mxu1 %vm333_vm0, %v280_v20  ;;  %v267_v28 = vpack.c.bf16 %v207_v19, %v206_v14  ;;  %v238_v30 = vld [vmem:[%s4213_s11 + $0x130] sm:$0xff]  ;;  %v239_v31 = vld [vmem:[%s4213_s11 + $0x138] sm:$0xff] }
  0x1e   : > { %3592 = vmatmul.mubr.msk.bf16.vlgmr.msra.gmra.mrb[0].mxu0 %vm333_vm0, %v265_v12  ;;  %v268_v29 = vpack.c.bf16 %v209_v25, %v208_v24  ;;  %v240_v32 = vld [vmem:[%s4213_s11 + $0x140] sm:$0xff]  ;;  %v241_v33 = vld [vmem:[%s4213_s11 + $0x148] sm:$0xff]  ;;  %v283_v35 = vpack.c.bf16 %v239_v31, %v238_v30  ;;  %v210_v36 = vld [vmem:[%s4213_s11 + $0x50] sm:$0xff] }
  0x1f   : > { %3595 = vmatprep.mubr.msk.bf16.mxu0 %vm333_vm0, %v266_v13  ;;  %3624 = vmatmul.mubr.msk.bf16.vlgmr.msra.gmra.mrb[0].mxu1 %vm333_vm0, %v281_v21  ;;  %v211_v37 = vld [vmem:[%s4213_s11 + $0x58] sm:$0xff]  ;;  %v212_v38 = vld [vmem:[%s4213_s11 + $0x60] sm:$0xff]  ;;  %v284_v39 = vpack.c.bf16 %v241_v33, %v240_v32  ;;  %v213_v40 = vld [vmem:[%s4213_s11 + $0x68] sm:$0xff] }
  0x20   : > { %3627 = vmatprep.mubr.msk.bf16.mxu1 %vm333_vm0, %v282_v26  ;;  %3656 = vmatpush3.bf16.msra.mxu1 %v4028_v11  ;;  %v242_v41 = vld [vmem:[%s4213_s11 + $0x150] sm:$0xff]  ;;  %v243_v42 = vld [vmem:[%s4213_s11 + $0x158] sm:$0xff]  ;;  %v269_v44 = vpack.c.bf16 %v211_v37, %v210_v36  ;;  %v244_v45 = vld [vmem:[%s4213_s11 + $0x160] sm:$0xff]  ;;  %v270_v46 = vpack.c.bf16 %v213_v40, %v212_v38 }
  0x21   : > { %3657 = vmatprep.subr.bf16.mxu1 %v4029_v27  ;;  %v245_v47 = vld [vmem:[%s4213_s11 + $0x168] sm:$0xff]  ;;  %v214_v49 = vld [vmem:[%s4213_s11 + $0x70] sm:$0xff]  ;;  %v215_v50 = vld [vmem:[%s4213_s11 + $0x78] sm:$0xff]  ;;  %v285_v53 = vpack.c.bf16 %v243_v42, %v242_v41 }
  0x22   : > { %v216_v51 = vld [vmem:[%s4213_s11 + $0x80] sm:$0xff]  ;;  %v217_v52 = vld [vmem:[%s4213_s11 + $0x88] sm:$0xff]  ;;  %v286_v55 = vpack.c.bf16 %v245_v47, %v244_v45  ;;  %v246_v56 = vld [vmem:[%s4213_s11 + $0x170] sm:$0xff]  ;;  %v271_v58 = vpack.c.bf16 %v215_v50, %v214_v49 }
  0x23   : > { %v247_v57 = vld [vmem:[%s4213_s11 + $0x178] sm:$0xff]  ;;  %v248_v59 = vld [vmem:[%s4213_s11 + $0x180] sm:$0xff]  ;;  %v249_v60 = vld [vmem:[%s4213_s11 + $0x188] sm:$0xff]  ;;  %v272_v62 = vpack.c.bf16 %v217_v52, %v216_v51 }
  0x24   : > { %3658 = vmatpush3.bf16.msra.mxu1 %v4029_v27  ;;  %v218_v63 = vld [vmem:[%s4213_s11 + $0x90] sm:$0xff]  ;;  %v219_v0 = vld [vmem:[%s4213_s11 + $0x98] sm:$0xff]  ;;  %v220_v1 = vld [vmem:[%s4213_s11 + $0xa0] sm:$0xff]  ;;  %v287_v3 = vpack.c.bf16 %v247_v57, %v246_v56  ;;  %v288_v4 = vpack.c.bf16 %v249_v60, %v248_v59 }
  0x25   : > { %3659 = vmatprep.subr.bf16.mxu1 %v4030_v34  ;;  %v221_v2 = vld [vmem:[%s4213_s11 + $0xa8] sm:$0xff]  ;;  %v250_v5 = vld [vmem:[%s4213_s11 + $0x190] sm:$0xff]  ;;  %v251_v6 = vld [vmem:[%s4213_s11 + $0x198] sm:$0xff]  ;;  %v273_v7 = vpack.c.bf16 %v219_v0, %v218_v63 }
  0x26   : > { %3596 = vmatmul.mubr.msk.bf16.gmra.mrb[4].mxu0 %vm333_vm0, %v267_v28  ;;  %v252_v8 = vld [vmem:[%s4213_s11 + $0x1a0] sm:$0xff]  ;;  %v253_v9 = vld [vmem:[%s4213_s11 + $0x1a8] sm:$0xff]  ;;  %v274_v10 = vpack.c.bf16 %v221_v2, %v220_v1  ;;  %v289_v11 = vpack.c.bf16 %v251_v6, %v250_v5  ;;  %v222_v12 = vld [vmem:[%s4213_s11 + $0xb0] sm:$0xff] }
  0x27   : > { %3599 = vmatprep.mubr.msk.bf16.mxu0 %vm333_vm0, %v268_v29  ;;  %3628 = vmatmul.mubr.msk.bf16.gmra.mrb[4].mxu1 %vm333_vm0, %v283_v35  ;;  %v223_v13 = vld [vmem:[%s4213_s11 + $0xb8] sm:$0xff]  ;;  %v290_v14 = vpack.c.bf16 %v253_v9, %v252_v8  ;;  %v224_v15 = vld [vmem:[%s4213_s11 + $0xc0] sm:$0xff]  ;;  %v225_v16 = vld [vmem:[%s4213_s11 + $0xc8] sm:$0xff] }
  0x28   : > { %3631 = vmatprep.mubr.msk.bf16.mxu1 %vm333_vm0, %v284_v39  ;;  %3660 = vmatpush3.bf16.msra.mxu1 %v4030_v34  ;;  %v275_v17 = vpack.c.bf16 %v223_v13, %v222_v12  ;;  %v276_v18 = vpack.c.bf16 %v225_v16, %v224_v15  ;;  %v254_v19 = vld [vmem:[%s4213_s11 + $0x1b0] sm:$0xff]  ;;  %v255_v20 = vld [vmem:[%s4213_s11 + $0x1b8] sm:$0xff]  ;;  %v256_v21 = vld [vmem:[%s4213_s11 + $0x1c0] sm:$0xff] }
  0x29   : > { %3661 = vmatprep.subr.bf16.mxu1 %v4031_v43  ;;  %v257_v22 = vld [vmem:[%s4213_s11 + $0x1c8] sm:$0xff]  ;;  %v291_v23 = vpack.c.bf16 %v255_v20, %v254_v19  ;;  %v226_v24 = vld [vmem:[%s4213_s11 + $0xd0] sm:$0xff]  ;;  %v227_v25 = vld [vmem:[%s4213_s11 + $0xd8] sm:$0xff] }
  0x2a   : > { %v292_v26 = vpack.c.bf16 %v257_v22, %v256_v21  ;;  %v228_v27 = vld [vmem:[%s4213_s11 + $0xe0] sm:$0xff]  ;;  %v229_v28 = vld [vmem:[%s4213_s11 + $0xe8] sm:$0xff]  ;;  %v277_v29 = vpack.c.bf16 %v227_v25, %v226_v24  ;;  %v258_v31 = vld [vmem:[%s4213_s11 + $0x1d0] sm:$0xff] }
  0x2b   : > { %v278_v30 = vpack.c.bf16 %v229_v28, %v228_v27  ;;  %v259_v32 = vld [vmem:[%s4213_s11 + $0x1d8] sm:$0xff]  ;;  %v260_v33 = vld [vmem:[%s4213_s11 + $0x1e0] sm:$0xff]  ;;  %v261_v34 = vld [vmem:[%s4213_s11 + $0x1e8] sm:$0xff] }
  0x2c   : > { %3662 = vmatpush3.bf16.msra.mxu1 %v4031_v43  ;;  %v293_v35 = vpack.c.bf16 %v259_v32, %v258_v31  ;;  %v230_v36 = vld [vmem:[%s4213_s11 + $0xf0] sm:$0xff]  ;;  %v231_v37 = vld [vmem:[%s4213_s11 + $0xf8] sm:$0xff]  ;;  %v294_v38 = vpack.c.bf16 %v261_v34, %v260_v33  ;;  %v4036_v52 = vld [vmem:[%s4882_s2 + $0x40] sm:$0xff]  }
  0x2d   : > { %3663 = vmatprep.subr.bf16.mxu1 %v4032_v48  ;;  %v279_v39 = vpack.c.bf16 %v231_v37, %v230_v36  ;;  %v262_v40 = vld [vmem:[%s4213_s11 + $0x1f0] sm:$0xff]  ;;  %v263_v41 = vld [vmem:[%s4213_s11 + $0x1f8] sm:$0xff]  ;;  %3735 = vmatprep.subr.bf16.mxu0 %v4036_v52  ;;  %v4040_v34 = vld [vmem:[%s4882_s2 + $0x60] sm:$0xff]  }
  0x2e   : > { %3600 = vmatmul.mubr.msk.bf16.gmra.mrb[8].mxu0 %vm333_vm0, %v269_v44  ;;  %v295_v42 = vpack.c.bf16 %v263_v41, %v262_v40  ;;  %v4035_v43 = vld [vmem:[%s4882_s2 + $0x38] sm:$0xff]   ;;  %v4341_v44 = vld [vmem:[%s4883_s3] ss:$0 sm:$0xff] }
  0x2f   : > { %3603 = vmatprep.mubr.msk.bf16.mxu0 %vm333_vm0, %v270_v46  ;;  %3632 = vmatmul.mubr.msk.bf16.gmra.mrb[8].mxu1 %vm333_vm0, %v285_v53  ;;  %v4037_v53 = vld [vmem:[%s4882_s2 + $0x48] sm:$0xff]  }
  0x30   : > { %3635 = vmatprep.mubr.msk.bf16.mxu1 %vm333_vm0, %v286_v55  ;;  %3664 = vmatpush3.bf16.msra.mxu1 %v4032_v48 }
  0x31   : > { %3665 = vmatprep.subr.bf16.mxu1 %v4033_v54  ;;  %3736 = vmatpush3.bf16.msra.mxu0 %v4036_v52 }
  0x32   : > { %3737 = vmatprep.subr.bf16.mxu0 %v4037_v53 }
  0x34   : > { %3666 = vmatpush3.bf16.msra.mxu1 %v4033_v54 }
  0x35   : > { %3667 = vmatprep.subr.bf16.mxu1 %v4034_v61  ;;  %3738 = vmatpush3.bf16.msra.mxu0 %v4037_v53 }
  0x36   : > { %3604 = vmatmul.mubr.msk.bf16.gmra.mrb[12].mxu0 %vm333_vm0, %v271_v58 }
  0x37   : > { %3607 = vmatprep.mubr.msk.bf16.mxu0 %vm333_vm0, %v272_v62  ;;  %3636 = vmatmul.mubr.msk.bf16.gmra.mrb[12].mxu1 %vm333_vm0, %v287_v3 }
  0x38   : > { %3639 = vmatprep.mubr.msk.bf16.mxu1 %vm333_vm0, %v288_v4  ;;  %3668 = vmatpush3.bf16.msra.mxu1 %v4034_v61  ;;  %v4038_v4 = vld [vmem:[%s4882_s2 + $0x50] sm:$0xff]  }
  0x39   : > { %3669 = vmatprep.subr.bf16.mxu1 %v4035_v43  ;;  %3739 = vmatprep.subr.bf16.mxu0 %v4038_v4 }
  0x3a   : > { %3740 = vmatpush3.bf16.msra.mxu0 %v4038_v4 }
  0x3c   : > { %3670 = vmatpush3.bf16.msra.mxu1 %v4035_v43 }
  0x3e   : > { %3608 = vmatmul.mubr.msk.bf16.gmra.mrb[16].mxu0 %vm333_vm0, %v273_v7 }
  0x3f   : > { %3611 = vmatprep.mubr.msk.bf16.mxu0 %vm333_vm0, %v274_v10  ;;  %3640 = vmatmul.mubr.msk.bf16.gmra.mrb[16].mxu1 %vm333_vm0, %v289_v11 }
  0x40   : > { %3643 = vmatprep.mubr.msk.bf16.mxu1 %vm333_vm0, %v290_v14 }
  0x46   : > { %3612 = vmatmul.mubr.msk.bf16.gmra.mrb[20].mxu0 %vm333_vm0, %v275_v17 }
  0x47   : > { %3615 = vmatprep.mubr.msk.bf16.mxu0 %vm333_vm0, %v276_v18  ;;  %3644 = vmatmul.mubr.msk.bf16.gmra.mrb[20].mxu1 %vm333_vm0, %v291_v23  ;;  %v4039_v18 = vld [vmem:[%s4882_s2 + $0x58] sm:$0xff]  }
  0x48   : > { %3647 = vmatprep.mubr.msk.bf16.mxu1 %vm333_vm0, %v292_v26  ;;  %3741 = vmatprep.subr.bf16.mxu0 %v4039_v18 }
  0x49   : > { %3742 = vmatpush3.bf16.msra.mxu0 %v4039_v18 }
  0x4a   : > { %3743 = vmatprep.subr.bf16.mxu0 %v4040_v34 }
  0x4d   : > { %3744 = vmatpush3.bf16.msra.mxu0 %v4040_v34 }
  0x4e   : > { %3616 = vmatmul.mubr.msk.bf16.gmra.mrb[24].mxu0 %vm333_vm0, %v277_v29 }
  0x4f   : > { %3619 = vmatprep.mubr.msk.bf16.mxu0 %vm333_vm0, %v278_v30  ;;  %3648 = vmatmul.mubr.msk.bf16.gmra.mrb[24].mxu1 %vm333_vm0, %v293_v35 }
  0x50   : > { %3651 = vmatprep.mubr.msk.bf16.mxu1 %vm333_vm0, %v294_v38 }
  0x56   : > { %3620 = vmatmul.mubr.msk.bf16.gmra.mrb[28].mxu0 %vm333_vm0, %v279_v39 }
  0x57   : > { %3652 = vmatmul.mubr.msk.bf16.gmra.mrb[28].mxu1 %vm333_vm0, %v295_v42 }
  0xf1   : > { %v3593_v45 = vpop.f32.mrb[0].mxu0 }
  0xf2   : > { %v473_v46 = vadd.f32 %v3593_v45, %v4341_v44  ;;  %v464_v47 = vpop.f32.mrb[1].mxu0  ;;  %v3625_v55 = vpop.f32.mrb[0].mxu1 }
  0xf3   : > { %v465_v48 = vadd.f32 %v4341_v44, %v464_v47  ;;  %v3594_v49 = vpop.f32.mrb[2].mxu0  ;;  %v601_v58 = vadd.f32 %v3625_v55, %v4341_v44  ;;  %v592_v59 = vpop.f32.mrb[1].mxu1 }
  0xf4   : > { %v476_v50 = vadd.f32 %v3594_v49, %v4341_v44  ;;  %v467_v51 = vpop.f32.mrb[3].mxu0  ;;  %v721_v56 = vmax.f32 %v473_v46, 0.0  ;;  %v593_v62 = vadd.f32 %v4341_v44, %v592_v59  ;;  %v3626_v63 = vpop.f32.mrb[2].mxu1  ;;  %v4041_v49 = vld [vmem:[%s4882_s2 + $0x68] sm:$0xff]  }
  0xf5   : > { %v468_v54 = vadd.f32 %v4341_v44, %v467_v51  ;;  %v719_v60 = vmax.f32 %v465_v48, 0.0  ;;  %v753_v1 = vmax.f32 %v601_v58, 0.0  ;;  %v604_v2 = vadd.f32 %v3626_v63, %v4341_v44  ;;  %v595_v3 = vpop.f32.mrb[3].mxu1  ;;  %3745 = vmatprep.subr.bf16.mxu0 %v4041_v49 }
  0xf6   : > { %v722_v57 = vmax.f32 %v476_v50, 0.0  ;;  %v751_v7 = vmax.f32 %v593_v62, 0.0  ;;  %v596_v8 = vadd.f32 %v4341_v44, %v595_v3  ;;  %3746 = vmatpush3.bf16.msra.mxu0 %v4041_v49 }
  0xf7   : > { %v720_v61 = vmax.f32 %v468_v54, 0.0  ;;  %v754_v11 = vmax.f32 %v604_v2, 0.0 }
  0xf8   : > { %v784_v0 = vpack.c.bf16 %v722_v57, %v721_v56  ;;  %v752_v14 = vmax.f32 %v596_v8, 0.0 }
  0xf9   : > { %v783_v5 = vpack.c.bf16 %v720_v61, %v719_v60  ;;  %v3597_v6 = vpop.f32.mrb[4].mxu0  ;;  %v4363_v17 = vpack.c.bf16 %v754_v11, %v753_v1  ;;  %v4042_v1 = vld [vmem:[%s4882_s2 + $0x70] sm:$0xff]  }
  0xfa   : > { %v489_v9 = vadd.f32 %v3597_v6, %v4341_v44  ;;  %v480_v10 = vpop.f32.mrb[5].mxu0  ;;  %v4369_v20 = vpack.c.bf16 %v752_v14, %v751_v7  ;;  %v3629_v21 = vpop.f32.mrb[4].mxu1  ;;  %3747 = vmatprep.subr.bf16.mxu0 %v4042_v1 }
  0xfb   : > { %v481_v12 = vadd.f32 %v4341_v44, %v480_v10  ;;  %v3598_v13 = vpop.f32.mrb[6].mxu0  ;;  %3671 = vmatprep.mubr.bf16.mxu1 %v783_v5  ;;  %v617_v24 = vadd.f32 %v3629_v21, %v4341_v44  ;;  %v608_v25 = vpop.f32.mrb[5].mxu1  ;;  %3748 = vmatpush3.bf16.msra.mxu0 %v4042_v1 }
  0xfc   : > { %v492_v15 = vadd.f32 %v3598_v13, %v4341_v44  ;;  %v483_v16 = vpop.f32.mrb[7].mxu0  ;;  %3672 = vmatmul.mubr.bf16.vlgmr.msra.gmra.mrb[32].mxu1 %v784_v0  ;;  %v725_v22 = vmax.f32 %v489_v9, 0.0  ;;  %v609_v28 = vadd.f32 %v4341_v44, %v608_v25  ;;  %v3630_v29 = vpop.f32.mrb[6].mxu1 }
  0xfd   : > { %v484_v19 = vadd.f32 %v4341_v44, %v483_v16  ;;  %v723_v26 = vmax.f32 %v481_v12, 0.0  ;;  %v757_v31 = vmax.f32 %v617_v24, 0.0  ;;  %v620_v32 = vadd.f32 %v3630_v29, %v4341_v44  ;;  %v611_v33 = vpop.f32.mrb[7].mxu1 }
  0xfe   : > { %v726_v23 = vmax.f32 %v492_v15, 0.0  ;;  %v755_v37 = vmax.f32 %v609_v28, 0.0  ;;  %v612_v38 = vadd.f32 %v4341_v44, %v611_v33 }
  0xff   : > { %v724_v27 = vmax.f32 %v484_v19, 0.0  ;;  %v758_v41 = vmax.f32 %v620_v32, 0.0 }
 0x100   : > { %v786_v30 = vpack.c.bf16 %v726_v23, %v725_v22  ;;  %v756_v45 = vmax.f32 %v612_v38, 0.0 }
 0x101   : > { %v785_v35 = vpack.c.bf16 %v724_v27, %v723_v26  ;;  %v3601_v36 = vpop.f32.mrb[8].mxu0  ;;  %v4381_v48 = vpack.c.bf16 %v758_v41, %v757_v31 }
 0x102   : > { %v505_v39 = vadd.f32 %v3601_v36, %v4341_v44  ;;  %v496_v40 = vpop.f32.mrb[9].mxu0  ;;  %v4387_v51 = vpack.c.bf16 %v756_v45, %v755_v37  ;;  %v3633_v52 = vpop.f32.mrb[8].mxu1 }
 0x103   : > { %v497_v42 = vadd.f32 %v4341_v44, %v496_v40  ;;  %v3602_v43 = vpop.f32.mrb[10].mxu0  ;;  %3675 = vmatprep.mubr.bf16.mxu1 %v785_v35  ;;  %v633_v55 = vadd.f32 %v3633_v52, %v4341_v44  ;;  %v624_v56 = vpop.f32.mrb[9].mxu1 }
 0x104   : > { %v508_v46 = vadd.f32 %v3602_v43, %v4341_v44  ;;  %v499_v47 = vpop.f32.mrb[11].mxu0  ;;  %3676 = vmatmul.mubr.bf16.gmra.mrb[36].mxu1 %v786_v30  ;;  %v729_v53 = vmax.f32 %v505_v39, 0.0  ;;  %v625_v59 = vadd.f32 %v4341_v44, %v624_v56  ;;  %v3634_v60 = vpop.f32.mrb[10].mxu1 }
 0x105   : > { %v500_v50 = vadd.f32 %v4341_v44, %v499_v47  ;;  %v727_v57 = vmax.f32 %v497_v42, 0.0  ;;  %v761_v62 = vmax.f32 %v633_v55, 0.0  ;;  %v636_v63 = vadd.f32 %v3634_v60, %v4341_v44  ;;  %v627_v0 = vpop.f32.mrb[11].mxu1 }
 0x106   : > { %v730_v54 = vmax.f32 %v508_v46, 0.0  ;;  %v759_v4 = vmax.f32 %v625_v59, 0.0  ;;  %v628_v5 = vadd.f32 %v4341_v44, %v627_v0 }
 0x107   : > { %v728_v58 = vmax.f32 %v500_v50, 0.0  ;;  %v762_v8 = vmax.f32 %v636_v63, 0.0 }
 0x108   : > { %v788_v61 = vpack.c.bf16 %v730_v54, %v729_v53  ;;  %v760_v11 = vmax.f32 %v628_v5, 0.0 }
 0x109   : > { %v787_v2 = vpack.c.bf16 %v728_v58, %v727_v57  ;;  %v3605_v3 = vpop.f32.mrb[12].mxu0  ;;  %v4399_v14 = vpack.c.bf16 %v762_v8, %v761_v62 }
 0x10a   : > { %v521_v6 = vadd.f32 %v3605_v3, %v4341_v44  ;;  %v512_v7 = vpop.f32.mrb[13].mxu0  ;;  %v4402_v16 = vpack.c.bf16 %v760_v11, %v759_v4  ;;  %v3637_v18 = vpop.f32.mrb[12].mxu1 }
 0x10b   : > { %v513_v9 = vadd.f32 %v4341_v44, %v512_v7  ;;  %v3606_v10 = vpop.f32.mrb[14].mxu0  ;;  %3679 = vmatprep.mubr.bf16.mxu1 %v787_v2  ;;  %v649_v22 = vadd.f32 %v3637_v18, %v4341_v44  ;;  %v640_v23 = vpop.f32.mrb[13].mxu1 }
 0x10c   : > { %v524_v12 = vadd.f32 %v3606_v10, %v4341_v44  ;;  %v515_v13 = vpop.f32.mrb[15].mxu0  ;;  %3680 = vmatmul.mubr.bf16.gmra.mrb[40].mxu1 %v788_v61  ;;  %v733_v19 = vmax.f32 %v521_v6, 0.0  ;;  %v641_v26 = vadd.f32 %v4341_v44, %v640_v23  ;;  %v3638_v27 = vpop.f32.mrb[14].mxu1 }
 0x10d   : > { %v516_v15 = vadd.f32 %v4341_v44, %v515_v13  ;;  %v731_v24 = vmax.f32 %v513_v9, 0.0  ;;  %v765_v29 = vmax.f32 %v649_v22, 0.0  ;;  %v652_v30 = vadd.f32 %v3638_v27, %v4341_v44  ;;  %v643_v31 = vpop.f32.mrb[15].mxu1 }
 0x10e   : > { %v734_v21 = vmax.f32 %v524_v12, 0.0  ;;  %v763_v34 = vmax.f32 %v641_v26, 0.0  ;;  %v644_v35 = vadd.f32 %v4341_v44, %v643_v31 }
 0x10f   : > { %v732_v25 = vmax.f32 %v516_v15, 0.0  ;;  %v766_v38 = vmax.f32 %v652_v30, 0.0 }
 0x110   : > { %v790_v28 = vpack.c.bf16 %v734_v21, %v733_v19  ;;  %v764_v41 = vmax.f32 %v644_v35, 0.0 }
 0x111   : > { %v789_v32 = vpack.c.bf16 %v732_v25, %v731_v24  ;;  %v3609_v33 = vpop.f32.mrb[16].mxu0  ;;  %v4411_v45 = vpack.c.bf16 %v766_v38, %v765_v29 }
 0x112   : > { %v537_v36 = vadd.f32 %v3609_v33, %v4341_v44  ;;  %v528_v37 = vpop.f32.mrb[17].mxu0  ;;  %v4414_v47 = vpack.c.bf16 %v764_v41, %v763_v34  ;;  %v3641_v49 = vpop.f32.mrb[16].mxu1 }
 0x113   : > { %v529_v39 = vadd.f32 %v4341_v44, %v528_v37  ;;  %v3610_v40 = vpop.f32.mrb[18].mxu0  ;;  %3683 = vmatprep.mubr.bf16.mxu1 %v789_v32  ;;  %v665_v53 = vadd.f32 %v3641_v49, %v4341_v44  ;;  %v656_v54 = vpop.f32.mrb[17].mxu1 }
 0x114   : > { %v540_v42 = vadd.f32 %v3610_v40, %v4341_v44  ;;  %v531_v43 = vpop.f32.mrb[19].mxu0  ;;  %3684 = vmatmul.mubr.bf16.gmra.mrb[44].mxu1 %v790_v28  ;;  %v737_v50 = vmax.f32 %v537_v36, 0.0  ;;  %v657_v57 = vadd.f32 %v4341_v44, %v656_v54  ;;  %v3642_v58 = vpop.f32.mrb[18].mxu1 }
 0x115   : > { %v532_v46 = vadd.f32 %v4341_v44, %v531_v43  ;;  %v735_v55 = vmax.f32 %v529_v39, 0.0  ;;  %v769_v60 = vmax.f32 %v665_v53, 0.0  ;;  %v668_v61 = vadd.f32 %v3642_v58, %v4341_v44  ;;  %v659_v62 = vpop.f32.mrb[19].mxu1 }
 0x116   : > { %v738_v52 = vmax.f32 %v540_v42, 0.0  ;;  %v767_v1 = vmax.f32 %v657_v57, 0.0  ;;  %v660_v2 = vadd.f32 %v4341_v44, %v659_v62 }
 0x117   : > { %v736_v56 = vmax.f32 %v532_v46, 0.0  ;;  %v770_v5 = vmax.f32 %v668_v61, 0.0 }
 0x118   : > { %v792_v59 = vpack.c.bf16 %v738_v52, %v737_v50  ;;  %v768_v8 = vmax.f32 %v660_v2, 0.0 }
 0x119   : > { %v791_v63 = vpack.c.bf16 %v736_v56, %v735_v55  ;;  %v3613_v0 = vpop.f32.mrb[20].mxu0  ;;  %v4423_v11 = vpack.c.bf16 %v770_v5, %v769_v60 }
 0x11a   : > { %v553_v3 = vadd.f32 %v3613_v0, %v4341_v44  ;;  %v544_v4 = vpop.f32.mrb[21].mxu0  ;;  %v4426_v13 = vpack.c.bf16 %v768_v8, %v767_v1  ;;  %v3645_v15 = vpop.f32.mrb[20].mxu1 }
 0x11b   : > { %v545_v6 = vadd.f32 %v4341_v44, %v544_v4  ;;  %v3614_v7 = vpop.f32.mrb[22].mxu0  ;;  %3687 = vmatprep.mubr.bf16.mxu1 %v791_v63  ;;  %v681_v21 = vadd.f32 %v3645_v15, %v4341_v44  ;;  %v672_v22 = vpop.f32.mrb[21].mxu1 }
 0x11c   : > { %v556_v9 = vadd.f32 %v3614_v7, %v4341_v44  ;;  %v547_v10 = vpop.f32.mrb[23].mxu0  ;;  %3688 = vmatmul.mubr.bf16.gmra.mrb[48].mxu1 %v792_v59  ;;  %v741_v18 = vmax.f32 %v553_v3, 0.0  ;;  %v673_v25 = vadd.f32 %v4341_v44, %v672_v22  ;;  %v3646_v26 = vpop.f32.mrb[22].mxu1 }
 0x11d   : > { %v548_v12 = vadd.f32 %v4341_v44, %v547_v10  ;;  %v739_v23 = vmax.f32 %v545_v6, 0.0  ;;  %v773_v28 = vmax.f32 %v681_v21, 0.0  ;;  %v684_v29 = vadd.f32 %v3646_v26, %v4341_v44  ;;  %v675_v30 = vpop.f32.mrb[23].mxu1 }
 0x11e   : > { %v742_v19 = vmax.f32 %v556_v9, 0.0  ;;  %v771_v33 = vmax.f32 %v673_v25, 0.0  ;;  %v676_v34 = vadd.f32 %v4341_v44, %v675_v30 }
 0x11f   : > { %v740_v24 = vmax.f32 %v548_v12, 0.0  ;;  %v774_v37 = vmax.f32 %v684_v29, 0.0 }
 0x120   : > { %v794_v27 = vpack.c.bf16 %v742_v19, %v741_v18  ;;  %v772_v40 = vmax.f32 %v676_v34, 0.0 }
 0x121   : > { %v793_v31 = vpack.c.bf16 %v740_v24, %v739_v23  ;;  %v3617_v32 = vpop.f32.mrb[24].mxu0  ;;  %v4435_v43 = vpack.c.bf16 %v774_v37, %v773_v28 }
 0x122   : > { %v569_v35 = vadd.f32 %v3617_v32, %v4341_v44  ;;  %v560_v36 = vpop.f32.mrb[25].mxu0  ;;  %v4438_v49 = vpack.c.bf16 %v772_v40, %v771_v33  ;;  %v3649_v50 = vpop.f32.mrb[24].mxu1 }
 0x123   : > { %v561_v38 = vadd.f32 %v4341_v44, %v560_v36  ;;  %v3618_v39 = vpop.f32.mrb[26].mxu0  ;;  %3691 = vmatprep.mubr.bf16.mxu1 %v793_v31  ;;  %v697_v54 = vadd.f32 %v3649_v50, %v4341_v44  ;;  %v688_v55 = vpop.f32.mrb[25].mxu1 }
 0x124   : > { %v572_v41 = vadd.f32 %v3618_v39, %v4341_v44  ;;  %v563_v42 = vpop.f32.mrb[27].mxu0  ;;  %3692 = vmatmul.mubr.bf16.gmra.mrb[52].mxu1 %v794_v27  ;;  %v745_v52 = vmax.f32 %v569_v35, 0.0  ;;  %v689_v58 = vadd.f32 %v4341_v44, %v688_v55  ;;  %v3650_v59 = vpop.f32.mrb[26].mxu1 }
 0x125   : > { %v564_v46 = vadd.f32 %v4341_v44, %v563_v42  ;;  %v743_v56 = vmax.f32 %v561_v38, 0.0  ;;  %v777_v61 = vmax.f32 %v697_v54, 0.0  ;;  %v700_v62 = vadd.f32 %v3650_v59, %v4341_v44  ;;  %v691_v63 = vpop.f32.mrb[27].mxu1  ;;  %v4047_v42 = vld [vmem:[%s4882_s2 + $0x98] sm:$0xff]   ;;  %v4048_v54 = vld [vmem:[%s4882_s2 + $0xa0] sm:$0xff]  }
 0x126   : > { %v746_v53 = vmax.f32 %v572_v41, 0.0  ;;  %v775_v2 = vmax.f32 %v689_v58, 0.0  ;;  %v692_v3 = vadd.f32 %v4341_v44, %v691_v63  ;;  %v4046_v41 = vld [vmem:[%s4882_s2 + $0x90] sm:$0xff]   ;;  %v4049_v63 = vld [vmem:[%s4882_s2 + $0xa8] sm:$0xff]  }
 0x127   : > { %v744_v57 = vmax.f32 %v564_v46, 0.0  ;;  %v778_v6 = vmax.f32 %v700_v62, 0.0 }
 0x128   : > { %v796_v60 = vpack.c.bf16 %v746_v53, %v745_v52  ;;  %v776_v9 = vmax.f32 %v692_v3, 0.0 }
 0x129   : > { %v795_v0 = vpack.c.bf16 %v744_v57, %v743_v56  ;;  %v3621_v1 = vpop.f32.mrb[28].mxu0  ;;  %v812_v15 = vpack.c.bf16 %v778_v6, %v777_v61  ;;  %v4050_v6 = vld [vmem:[%s4882_s2 + $0xb0] sm:$0xff]  }
 0x12a   : > { %v585_v4 = vadd.f32 %v3621_v1, %v4341_v44  ;;  %v576_v5 = vpop.f32.mrb[29].mxu0  ;;  %v811_v19 = vpack.c.bf16 %v776_v9, %v775_v2  ;;  %v3653_v21 = vpop.f32.mrb[28].mxu1 }
 0x12b   : > { %v577_v7 = vadd.f32 %v4341_v44, %v576_v5  ;;  %v3622_v8 = vpop.f32.mrb[30].mxu0  ;;  %3695 = vmatprep.mubr.bf16.mxu1 %v795_v0  ;;  %v713_v24 = vadd.f32 %v3653_v21, %v4341_v44  ;;  %v704_v25 = vpop.f32.mrb[29].mxu1  ;;  %v4051_v21 = vld [vmem:[%s4882_s2 + $0xb8] sm:$0xff]  }
 0x12c   : > { %v588_v10 = vadd.f32 %v3622_v8, %v4341_v44  ;;  %v579_v12 = vpop.f32.mrb[31].mxu0  ;;  %3696 = vmatmul.mubr.bf16.gmra.mrb[56].mxu1 %v796_v60  ;;  %v749_v22 = vmax.f32 %v585_v4, 0.0  ;;  %v705_v28 = vadd.f32 %v4341_v44, %v704_v25  ;;  %v3654_v29 = vpop.f32.mrb[30].mxu1 }
 0x12d   : > { %v580_v18 = vadd.f32 %v4341_v44, %v579_v12  ;;  %v747_v26 = vmax.f32 %v577_v7, 0.0  ;;  %v781_v31 = vmax.f32 %v713_v24, 0.0  ;;  %v716_v32 = vadd.f32 %v3654_v29, %v4341_v44  ;;  %v707_v33 = vpop.f32.mrb[31].mxu1 }
 0x12e   : > { %v750_v23 = vmax.f32 %v588_v10, 0.0  ;;  %v779_v35 = vmax.f32 %v705_v28, 0.0  ;;  %v708_v36 = vadd.f32 %v4341_v44, %v707_v33  ;;  %v4043_v44 = vld [vmem:[%s4882_s2 + $0x78] sm:$0xff]  }
 0x12f   : > { %v748_v27 = vmax.f32 %v580_v18, 0.0  ;;  %v782_v37 = vmax.f32 %v716_v32, 0.0  ;;  %3749 = vmatprep.subr.bf16.mxu0 %v4043_v44 }
 0x130   : > { %v798_v30 = vpack.c.bf16 %v750_v23, %v749_v22  ;;  %v780_v38 = vmax.f32 %v708_v36, 0.0  ;;  %3750 = vmatpush3.bf16.msra.mxu0 %v4043_v44 }
 0x131   : > { %v797_v34 = vpack.c.bf16 %v748_v27, %v747_v26  ;;  %v814_v39 = vpack.c.bf16 %v782_v37, %v781_v31 }
 0x132   : > { %v813_v40 = vpack.c.bf16 %v780_v38, %v779_v35 }
 0x133   : > { %3699 = vmatprep.mubr.bf16.mxu1 %v797_v34 }
 0x134   : > { %3700 = vmatmul.mubr.bf16.gmra.mrb[60].mxu1 %v798_v30 }
 0x135   : > { %3703 = vmatprep.mubr.bf16.mxu1 %v4369_v20  ;;  %v4045_v20 = vld [vmem:[%s4882_s2 + $0x88] sm:$0xff]  }
 0x13c   : > { %3704 = vmatmul.mubr.bf16.gmra.mrb[64].mxu1 %v4363_v17  ;;  %v4044_v17 = vld [vmem:[%s4882_s2 + $0x80] sm:$0xff]  }
 0x13d   : > { %3707 = vmatprep.mubr.bf16.mxu1 %v4387_v51  ;;  %3815 = vmatprep.subr.bf16.mxu1 %v4044_v17 }
 0x13e   : > { %3816 = vmatpush3.bf16.msra.mxu1 %v4044_v17 }
 0x13f   : > { %3817 = vmatprep.subr.bf16.mxu1 %v4045_v20 }
 0x142   : > { %3818 = vmatpush3.bf16.msra.mxu1 %v4045_v20 }
 0x143   : > { %3819 = vmatprep.subr.bf16.mxu1 %v4046_v41 }
 0x144   : > { %3708 = vmatmul.mubr.bf16.gmra.mrb[68].mxu1 %v4381_v48  ;;  %v4476_v48 = vld [vmem:[%s4883_s3 + $0x1] ss:$0 sm:$0xff] }
 0x145   : > { %3711 = vmatprep.mubr.bf16.mxu1 %v4402_v16 }
 0x146   : > { %3820 = vmatpush3.bf16.msra.mxu1 %v4046_v41 }
 0x147   : > { %3821 = vmatprep.subr.bf16.mxu1 %v4047_v42 }
 0x14a   : > { %3822 = vmatpush3.bf16.msra.mxu1 %v4047_v42 }
 0x14b   : > { %3823 = vmatprep.subr.bf16.mxu1 %v4048_v54 }
 0x14c   : > { %3712 = vmatmul.mubr.bf16.gmra.mrb[72].mxu1 %v4399_v14 }
 0x14d   : > { %3715 = vmatprep.mubr.bf16.mxu1 %v4414_v47 }
 0x14e   : > { %3824 = vmatpush3.bf16.msra.mxu1 %v4048_v54 }
 0x14f   : > { %3825 = vmatprep.subr.bf16.mxu1 %v4049_v63 }
 0x152   : > { %3826 = vmatpush3.bf16.msra.mxu1 %v4049_v63 }
 0x153   : > { %3827 = vmatprep.subr.bf16.mxu1 %v4050_v6 }
 0x154   : > { %3716 = vmatmul.mubr.bf16.gmra.mrb[76].mxu1 %v4411_v45 }
 0x155   : > { %3719 = vmatprep.mubr.bf16.mxu1 %v4426_v13 }
 0x156   : > { %3828 = vmatpush3.bf16.msra.mxu1 %v4050_v6 }
 0x157   : > { %3829 = vmatprep.subr.bf16.mxu1 %v4051_v21 }
 0x15a   : > { %3830 = vmatpush3.bf16.msra.mxu1 %v4051_v21 }
 0x15c   : > { %3720 = vmatmul.mubr.bf16.gmra.mrb[80].mxu1 %v4423_v11 }
 0x15d   : > { %3723 = vmatprep.mubr.bf16.mxu1 %v4438_v49 }
 0x164   : > { %3724 = vmatmul.mubr.bf16.gmra.mrb[84].mxu1 %v4435_v43 }
 0x165   : > { %3727 = vmatprep.mubr.bf16.mxu1 %v811_v19 }
 0x16c   : > { %3728 = vmatmul.mubr.bf16.gmra.mrb[88].mxu1 %v812_v15 }
 0x16d   : > { %3731 = vmatprep.mubr.bf16.mxu1 %v813_v40 }
 0x174   : > { %3732 = vmatmul.mubr.bf16.gmra.mrb[92].mxu1 %v814_v39 }
 0x1cf   : > { %v3673_v51 = vpop.f32.mrb[32].mxu1 }
 0x1d0   : > { %v927_v14 = vadd.f32 %v3673_v51, %v4476_v48  ;;  %v918_v16 = vpop.f32.mrb[33].mxu1 }
 0x1d1   : > { %v919_v45 = vadd.f32 %v4476_v48, %v918_v16  ;;  %v3674_v47 = vpop.f32.mrb[34].mxu1 }
 0x1d2   : > { %v930_v11 = vadd.f32 %v3674_v47, %v4476_v48  ;;  %v921_v13 = vpop.f32.mrb[35].mxu1  ;;  %v1175_v46 = vmax.f32 %v927_v14, 0.0 }
 0x1d3   : > { %v922_v43 = vadd.f32 %v4476_v48, %v921_v13  ;;  %v1173_v50 = vmax.f32 %v919_v45, 0.0 }
 0x1d4   : > { %v1176_v49 = vmax.f32 %v930_v11, 0.0 }
 0x1d5   : > { %v1174_v52 = vmax.f32 %v922_v43, 0.0 }
 0x1d6   : > { %v1238_v53 = vpack.c.bf16 %v1176_v49, %v1175_v46 }
 0x1d7   : > { %v1237_v55 = vpack.c.bf16 %v1174_v52, %v1173_v50  ;;  %v3677_v56 = vpop.f32.mrb[36].mxu1 }
 0x1d8   : > { %v943_v57 = vadd.f32 %v3677_v56, %v4476_v48  ;;  %v934_v58 = vpop.f32.mrb[37].mxu1 }
 0x1d9   : > { %v935_v59 = vadd.f32 %v4476_v48, %v934_v58  ;;  %v3678_v60 = vpop.f32.mrb[38].mxu1  ;;  %3751 = vmatprep.mubr.bf16.mxu0 %v1237_v55 }
 0x1da   : > { %v946_v61 = vadd.f32 %v3678_v60, %v4476_v48  ;;  %v937_v62 = vpop.f32.mrb[39].mxu1  ;;  %3752 = vmatmul.mubr.bf16.vlgmr.msra.gmra.mrb[32].mxu0 %v1238_v53  ;;  %v1179_v1 = vmax.f32 %v943_v57, 0.0 }
 0x1db   : > { %v938_v0 = vadd.f32 %v4476_v48, %v937_v62  ;;  %v1177_v3 = vmax.f32 %v935_v59, 0.0 }
 0x1dc   : > { %v1180_v2 = vmax.f32 %v946_v61, 0.0 }
 0x1dd   : > { %v1178_v4 = vmax.f32 %v938_v0, 0.0 }
 0x1de   : > { %v1240_v5 = vpack.c.bf16 %v1180_v2, %v1179_v1 }
 0x1df   : > { %v1239_v7 = vpack.c.bf16 %v1178_v4, %v1177_v3  ;;  %v3681_v8 = vpop.f32.mrb[40].mxu1 }
 0x1e0   : > { %v959_v9 = vadd.f32 %v3681_v8, %v4476_v48  ;;  %v950_v10 = vpop.f32.mrb[41].mxu1 }
 0x1e1   : > { %v951_v12 = vadd.f32 %v4476_v48, %v950_v10  ;;  %v3682_v15 = vpop.f32.mrb[42].mxu1  ;;  %3755 = vmatprep.mubr.bf16.mxu0 %v1239_v7 }
 0x1e2   : > { %v962_v18 = vadd.f32 %v3682_v15, %v4476_v48  ;;  %v953_v19 = vpop.f32.mrb[43].mxu1  ;;  %3756 = vmatmul.mubr.bf16.gmra.mrb[36].mxu0 %v1240_v5  ;;  %v1183_v23 = vmax.f32 %v959_v9, 0.0 }
 0x1e3   : > { %v954_v22 = vadd.f32 %v4476_v48, %v953_v19  ;;  %v1181_v25 = vmax.f32 %v951_v12, 0.0 }
 0x1e4   : > { %v1184_v24 = vmax.f32 %v962_v18, 0.0 }
 0x1e5   : > { %v1182_v26 = vmax.f32 %v954_v22, 0.0 }
 0x1e6   : > { %v1242_v27 = vpack.c.bf16 %v1184_v24, %v1183_v23 }
 0x1e7   : > { %v1241_v28 = vpack.c.bf16 %v1182_v26, %v1181_v25  ;;  %v3685_v29 = vpop.f32.mrb[44].mxu1 }
 0x1e8   : > { %v975_v30 = vadd.f32 %v3685_v29, %v4476_v48  ;;  %v966_v31 = vpop.f32.mrb[45].mxu1 }
 0x1e9   : > { %v967_v32 = vadd.f32 %v4476_v48, %v966_v31  ;;  %v3686_v33 = vpop.f32.mrb[46].mxu1  ;;  %3759 = vmatprep.mubr.bf16.mxu0 %v1241_v28 }
 0x1ea   : > { %v978_v34 = vadd.f32 %v3686_v33, %v4476_v48  ;;  %v969_v35 = vpop.f32.mrb[47].mxu1  ;;  %3760 = vmatmul.mubr.bf16.gmra.mrb[40].mxu0 %v1242_v27  ;;  %v1187_v37 = vmax.f32 %v975_v30, 0.0 }
 0x1eb   : > { %v970_v36 = vadd.f32 %v4476_v48, %v969_v35  ;;  %v1185_v39 = vmax.f32 %v967_v32, 0.0 }
 0x1ec   : > { %v1188_v38 = vmax.f32 %v978_v34, 0.0 }
 0x1ed   : > { %v1186_v40 = vmax.f32 %v970_v36, 0.0 }
 0x1ee   : > { %v1244_v44 = vpack.c.bf16 %v1188_v38, %v1187_v37 }
 0x1ef   : > { %v1243_v17 = vpack.c.bf16 %v1186_v40, %v1185_v39  ;;  %v3689_v20 = vpop.f32.mrb[48].mxu1 }
 0x1f0   : > { %v991_v51 = vadd.f32 %v3689_v20, %v4476_v48  ;;  %v982_v14 = vpop.f32.mrb[49].mxu1 }
 0x1f1   : > { %v983_v16 = vadd.f32 %v4476_v48, %v982_v14  ;;  %v3690_v45 = vpop.f32.mrb[50].mxu1  ;;  %3763 = vmatprep.mubr.bf16.mxu0 %v1243_v17 }
 0x1f2   : > { %v994_v47 = vadd.f32 %v3690_v45, %v4476_v48  ;;  %v985_v11 = vpop.f32.mrb[51].mxu1  ;;  %3764 = vmatmul.mubr.bf16.gmra.mrb[44].mxu0 %v1244_v44  ;;  %v1191_v41 = vmax.f32 %v991_v51, 0.0 }
 0x1f3   : > { %v986_v13 = vadd.f32 %v4476_v48, %v985_v11  ;;  %v1189_v43 = vmax.f32 %v983_v16, 0.0 }
 0x1f4   : > { %v1192_v42 = vmax.f32 %v994_v47, 0.0 }
 0x1f5   : > { %v1190_v46 = vmax.f32 %v986_v13, 0.0 }
 0x1f6   : > { %v1246_v49 = vpack.c.bf16 %v1192_v42, %v1191_v41 }
 0x1f7   : > { %v1245_v50 = vpack.c.bf16 %v1190_v46, %v1189_v43  ;;  %v3693_v52 = vpop.f32.mrb[52].mxu1 }
 0x1f8   : > { %v1007_v53 = vadd.f32 %v3693_v52, %v4476_v48  ;;  %v998_v54 = vpop.f32.mrb[53].mxu1 }
 0x1f9   : > { %v999_v55 = vadd.f32 %v4476_v48, %v998_v54  ;;  %v3694_v56 = vpop.f32.mrb[54].mxu1  ;;  %3767 = vmatprep.mubr.bf16.mxu0 %v1245_v50 }
 0x1fa   : > { %v1010_v57 = vadd.f32 %v3694_v56, %v4476_v48  ;;  %v1001_v58 = vpop.f32.mrb[55].mxu1  ;;  %3768 = vmatmul.mubr.bf16.gmra.mrb[48].mxu0 %v1246_v49  ;;  %v1195_v60 = vmax.f32 %v1007_v53, 0.0 }
 0x1fb   : > { %v1002_v59 = vadd.f32 %v4476_v48, %v1001_v58  ;;  %v1193_v62 = vmax.f32 %v999_v55, 0.0 }
 0x1fc   : > { %v1196_v61 = vmax.f32 %v1010_v57, 0.0 }
 0x1fd   : > { %v1194_v63 = vmax.f32 %v1002_v59, 0.0 }
 0x1fe   : > { %v1248_v0 = vpack.c.bf16 %v1196_v61, %v1195_v60 }
 0x1ff   : > { %v1247_v1 = vpack.c.bf16 %v1194_v63, %v1193_v62  ;;  %v3697_v2 = vpop.f32.mrb[56].mxu1 }
 0x200   : > { %v1023_v3 = vadd.f32 %v3697_v2, %v4476_v48  ;;  %v1014_v4 = vpop.f32.mrb[57].mxu1 }
 0x201   : > { %v1015_v5 = vadd.f32 %v4476_v48, %v1014_v4  ;;  %v3698_v6 = vpop.f32.mrb[58].mxu1  ;;  %3771 = vmatprep.mubr.bf16.mxu0 %v1247_v1 }
 0x202   : > { %v1026_v7 = vadd.f32 %v3698_v6, %v4476_v48  ;;  %v1017_v8 = vpop.f32.mrb[59].mxu1  ;;  %3772 = vmatmul.mubr.bf16.gmra.mrb[52].mxu0 %v1248_v0  ;;  %v1199_v10 = vmax.f32 %v1023_v3, 0.0 }
 0x203   : > { %v1018_v9 = vadd.f32 %v4476_v48, %v1017_v8  ;;  %v1197_v15 = vmax.f32 %v1015_v5, 0.0 }
 0x204   : > { %v1200_v12 = vmax.f32 %v1026_v7, 0.0 }
 0x205   : > { %v1198_v18 = vmax.f32 %v1018_v9, 0.0 }
 0x206   : > { %v1250_v19 = vpack.c.bf16 %v1200_v12, %v1199_v10 }
 0x207   : > { %v1249_v21 = vpack.c.bf16 %v1198_v18, %v1197_v15  ;;  %v3701_v22 = vpop.f32.mrb[60].mxu1 }
 0x208   : > { %v1039_v23 = vadd.f32 %v3701_v22, %v4476_v48  ;;  %v1030_v24 = vpop.f32.mrb[61].mxu1 }
 0x209   : > { %v1031_v25 = vadd.f32 %v4476_v48, %v1030_v24  ;;  %v3702_v26 = vpop.f32.mrb[62].mxu1  ;;  %3775 = vmatprep.mubr.bf16.mxu0 %v1249_v21 }
 0x20a   : > { %v1042_v27 = vadd.f32 %v3702_v26, %v4476_v48  ;;  %v1033_v28 = vpop.f32.mrb[63].mxu1  ;;  %3776 = vmatmul.mubr.bf16.gmra.mrb[56].mxu0 %v1250_v19  ;;  %v1203_v30 = vmax.f32 %v1039_v23, 0.0 }
 0x20b   : > { %v1034_v29 = vadd.f32 %v4476_v48, %v1033_v28  ;;  %v1201_v32 = vmax.f32 %v1031_v25, 0.0 }
 0x20c   : > { %v1204_v31 = vmax.f32 %v1042_v27, 0.0 }
 0x20d   : > { %v1202_v33 = vmax.f32 %v1034_v29, 0.0 }
 0x20e   : > { %v1252_v34 = vpack.c.bf16 %v1204_v31, %v1203_v30 }
 0x20f   : > { %v1251_v35 = vpack.c.bf16 %v1202_v33, %v1201_v32  ;;  %v3705_v36 = vpop.f32.mrb[64].mxu1 }
 0x210   : > { %v1055_v37 = vadd.f32 %v3705_v36, %v4476_v48  ;;  %v1046_v38 = vpop.f32.mrb[65].mxu1 }
 0x211   : > { %v1047_v39 = vadd.f32 %v4476_v48, %v1046_v38  ;;  %v3706_v40 = vpop.f32.mrb[66].mxu1  ;;  %3779 = vmatprep.mubr.bf16.mxu0 %v1251_v35 }
 0x212   : > { %v1058_v44 = vadd.f32 %v3706_v40, %v4476_v48  ;;  %v1049_v17 = vpop.f32.mrb[67].mxu1  ;;  %3780 = vmatmul.mubr.bf16.gmra.mrb[60].mxu0 %v1252_v34  ;;  %v1207_v51 = vmax.f32 %v1055_v37, 0.0 }
 0x213   : > { %v1050_v20 = vadd.f32 %v4476_v48, %v1049_v17  ;;  %v1205_v16 = vmax.f32 %v1047_v39, 0.0 }
 0x214   : > { %v1208_v14 = vmax.f32 %v1058_v44, 0.0 }
 0x215   : > { %v1206_v45 = vmax.f32 %v1050_v20, 0.0 }
 0x216   : > { %v1254_v47 = vpack.c.bf16 %v1208_v14, %v1207_v51 }
 0x217   : > { %v1253_v11 = vpack.c.bf16 %v1206_v45, %v1205_v16  ;;  %v3709_v13 = vpop.f32.mrb[68].mxu1 }
 0x218   : > { %v1071_v41 = vadd.f32 %v3709_v13, %v4476_v48  ;;  %v1062_v42 = vpop.f32.mrb[69].mxu1 }
 0x219   : > { %v1063_v43 = vadd.f32 %v4476_v48, %v1062_v42  ;;  %v3710_v46 = vpop.f32.mrb[70].mxu1  ;;  %3783 = vmatprep.mubr.bf16.mxu0 %v1253_v11 }
 0x21a   : > { %v1074_v49 = vadd.f32 %v3710_v46, %v4476_v48  ;;  %v1065_v50 = vpop.f32.mrb[71].mxu1  ;;  %3784 = vmatmul.mubr.bf16.gmra.mrb[64].mxu0 %v1254_v47  ;;  %v1211_v53 = vmax.f32 %v1071_v41, 0.0 }
 0x21b   : > { %v1066_v52 = vadd.f32 %v4476_v48, %v1065_v50  ;;  %v1209_v55 = vmax.f32 %v1063_v43, 0.0 }
 0x21c   : > { %v1212_v54 = vmax.f32 %v1074_v49, 0.0 }
 0x21d   : > { %v1210_v56 = vmax.f32 %v1066_v52, 0.0 }
 0x21e   : > { %v1256_v57 = vpack.c.bf16 %v1212_v54, %v1211_v53 }
 0x21f   : > { %v1255_v58 = vpack.c.bf16 %v1210_v56, %v1209_v55  ;;  %v3713_v59 = vpop.f32.mrb[72].mxu1 }
 0x220   : > { %v1087_v60 = vadd.f32 %v3713_v59, %v4476_v48  ;;  %v1078_v61 = vpop.f32.mrb[73].mxu1 }
 0x221   : > { %v1079_v62 = vadd.f32 %v4476_v48, %v1078_v61  ;;  %v3714_v63 = vpop.f32.mrb[74].mxu1  ;;  %3787 = vmatprep.mubr.bf16.mxu0 %v1255_v58 }
 0x222   : > { %v1090_v0 = vadd.f32 %v3714_v63, %v4476_v48  ;;  %v1081_v1 = vpop.f32.mrb[75].mxu1  ;;  %3788 = vmatmul.mubr.bf16.gmra.mrb[68].mxu0 %v1256_v57  ;;  %v1215_v3 = vmax.f32 %v1087_v60, 0.0 }
 0x223   : > { %v1082_v2 = vadd.f32 %v4476_v48, %v1081_v1  ;;  %v1213_v5 = vmax.f32 %v1079_v62, 0.0 }
 0x224   : > { %v1216_v4 = vmax.f32 %v1090_v0, 0.0 }
 0x225   : > { %v1214_v6 = vmax.f32 %v1082_v2, 0.0 }
 0x226   : > { %v1258_v7 = vpack.c.bf16 %v1216_v4, %v1215_v3 }
 0x227   : > { %v1257_v8 = vpack.c.bf16 %v1214_v6, %v1213_v5  ;;  %v3717_v9 = vpop.f32.mrb[76].mxu1 }
 0x228   : > { %v1103_v10 = vadd.f32 %v3717_v9, %v4476_v48  ;;  %v1094_v12 = vpop.f32.mrb[77].mxu1 }
 0x229   : > { %v1095_v15 = vadd.f32 %v4476_v48, %v1094_v12  ;;  %v3718_v18 = vpop.f32.mrb[78].mxu1  ;;  %3791 = vmatprep.mubr.bf16.mxu0 %v1257_v8 }
 0x22a   : > { %v1106_v19 = vadd.f32 %v3718_v18, %v4476_v48  ;;  %v1097_v21 = vpop.f32.mrb[79].mxu1  ;;  %3792 = vmatmul.mubr.bf16.gmra.mrb[72].mxu0 %v1258_v7  ;;  %v1219_v23 = vmax.f32 %v1103_v10, 0.0 }
 0x22b   : > { %v1098_v22 = vadd.f32 %v4476_v48, %v1097_v21  ;;  %v1217_v25 = vmax.f32 %v1095_v15, 0.0 }
 0x22c   : > { %v1220_v24 = vmax.f32 %v1106_v19, 0.0 }
 0x22d   : > { %v1218_v26 = vmax.f32 %v1098_v22, 0.0  ;;  %v4052_v22 = vld [vmem:[%s4882_s2 + $0xc0] sm:$0xff]  }
 0x22e   : > { %v1260_v27 = vpack.c.bf16 %v1220_v24, %v1219_v23  ;;  %3895 = vmatprep.subr.bf16.mxu0 %v4052_v22  ;;  %v4053_v23 = vld [vmem:[%s4882_s2 + $0xc8] sm:$0xff]  }
 0x22f   : > { %v1259_v28 = vpack.c.bf16 %v1218_v26, %v1217_v25  ;;  %v3721_v29 = vpop.f32.mrb[80].mxu1  ;;  %3896 = vmatpush3.bf16.msra.mxu0 %v4052_v22 }
 0x230   : > { %v1119_v30 = vadd.f32 %v3721_v29, %v4476_v48  ;;  %v1110_v31 = vpop.f32.mrb[81].mxu1  ;;  %3897 = vmatprep.subr.bf16.mxu0 %v4053_v23 }
 0x231   : > { %v1111_v32 = vadd.f32 %v4476_v48, %v1110_v31  ;;  %v3722_v33 = vpop.f32.mrb[82].mxu1  ;;  %3795 = vmatprep.mubr.bf16.mxu0 %v1259_v28  ;;  %v4054_v31 = vld [vmem:[%s4882_s2 + $0xd0] sm:$0xff]  }
 0x232   : > { %v1122_v34 = vadd.f32 %v3722_v33, %v4476_v48  ;;  %v1113_v35 = vpop.f32.mrb[83].mxu1  ;;  %3796 = vmatmul.mubr.bf16.gmra.mrb[76].mxu0 %v1260_v27  ;;  %v1223_v37 = vmax.f32 %v1119_v30, 0.0 }
 0x233   : > { %v1114_v36 = vadd.f32 %v4476_v48, %v1113_v35  ;;  %v1221_v39 = vmax.f32 %v1111_v32, 0.0  ;;  %3898 = vmatpush3.bf16.msra.mxu0 %v4053_v23  ;;  %v4055_v32 = vld [vmem:[%s4882_s2 + $0xd8] sm:$0xff]  }
 0x234   : > { %v1224_v38 = vmax.f32 %v1122_v34, 0.0  ;;  %3899 = vmatprep.subr.bf16.mxu0 %v4054_v31 }
 0x235   : > { %v1222_v40 = vmax.f32 %v1114_v36, 0.0 }
 0x236   : > { %v1262_v44 = vpack.c.bf16 %v1224_v38, %v1223_v37 }
 0x237   : > { %v1261_v17 = vpack.c.bf16 %v1222_v40, %v1221_v39  ;;  %v3725_v20 = vpop.f32.mrb[84].mxu1  ;;  %3900 = vmatpush3.bf16.msra.mxu0 %v4054_v31  ;;  %v4056_v39 = vld [vmem:[%s4882_s2 + $0xe0] sm:$0xff]  }
 0x238   : > { %v1135_v51 = vadd.f32 %v3725_v20, %v4476_v48  ;;  %v1126_v14 = vpop.f32.mrb[85].mxu1  ;;  %3901 = vmatprep.subr.bf16.mxu0 %v4055_v32 }
 0x239   : > { %v1127_v16 = vadd.f32 %v4476_v48, %v1126_v14  ;;  %v3726_v45 = vpop.f32.mrb[86].mxu1  ;;  %3799 = vmatprep.mubr.bf16.mxu0 %v1261_v17 }
 0x23a   : > { %v1138_v47 = vadd.f32 %v3726_v45, %v4476_v48  ;;  %v1129_v11 = vpop.f32.mrb[87].mxu1  ;;  %3800 = vmatmul.mubr.bf16.gmra.mrb[80].mxu0 %v1262_v44  ;;  %v1227_v41 = vmax.f32 %v1135_v51, 0.0 }
 0x23b   : > { %v1130_v13 = vadd.f32 %v4476_v48, %v1129_v11  ;;  %v1225_v43 = vmax.f32 %v1127_v16, 0.0  ;;  %3902 = vmatpush3.bf16.msra.mxu0 %v4055_v32 }
 0x23c   : > { %v1228_v42 = vmax.f32 %v1138_v47, 0.0  ;;  %3903 = vmatprep.subr.bf16.mxu0 %v4056_v39  ;;  %v4057_v47 = vld [vmem:[%s4882_s2 + $0xe8] sm:$0xff]  }
 0x23d   : > { %v1226_v46 = vmax.f32 %v1130_v13, 0.0 }
 0x23e   : > { %v1264_v49 = vpack.c.bf16 %v1228_v42, %v1227_v41 }
 0x23f   : > { %v1263_v50 = vpack.c.bf16 %v1226_v46, %v1225_v43  ;;  %v3729_v52 = vpop.f32.mrb[88].mxu1  ;;  %3904 = vmatpush3.bf16.msra.mxu0 %v4056_v39 }
 0x240   : > { %v1151_v53 = vadd.f32 %v3729_v52, %v4476_v48  ;;  %v1142_v54 = vpop.f32.mrb[89].mxu1  ;;  %3905 = vmatprep.subr.bf16.mxu0 %v4057_v47 }
 0x241   : > { %v1143_v55 = vadd.f32 %v4476_v48, %v1142_v54  ;;  %v3730_v56 = vpop.f32.mrb[90].mxu1  ;;  %3803 = vmatprep.mubr.bf16.mxu0 %v1263_v50 }
 0x242   : > { %v1154_v57 = vadd.f32 %v3730_v56, %v4476_v48  ;;  %v1145_v58 = vpop.f32.mrb[91].mxu1  ;;  %3804 = vmatmul.mubr.bf16.gmra.mrb[84].mxu0 %v1264_v49  ;;  %v1231_v60 = vmax.f32 %v1151_v53, 0.0  ;;  %v4058_v49 = vld [vmem:[%s4882_s2 + $0xf0] sm:$0xff]  }
 0x243   : > { %v1146_v59 = vadd.f32 %v4476_v48, %v1145_v58  ;;  %v1229_v62 = vmax.f32 %v1143_v55, 0.0  ;;  %3906 = vmatpush3.bf16.msra.mxu0 %v4057_v47 }
 0x244   : > { %v1232_v61 = vmax.f32 %v1154_v57, 0.0  ;;  %3907 = vmatprep.subr.bf16.mxu0 %v4058_v49 }
 0x245   : > { %v1230_v63 = vmax.f32 %v1146_v59, 0.0  ;;  %v4059_v59 = vld [vmem:[%s4882_s2 + $0xf8] sm:$0xff]  }
 0x246   : > { %v1266_v0 = vpack.c.bf16 %v1232_v61, %v1231_v60 }
 0x247   : > { %v1265_v1 = vpack.c.bf16 %v1230_v63, %v1229_v62  ;;  %v3733_v2 = vpop.f32.mrb[92].mxu1  ;;  %3908 = vmatpush3.bf16.msra.mxu0 %v4058_v49 }
 0x248   : > { %v1167_v3 = vadd.f32 %v3733_v2, %v4476_v48  ;;  %v1158_v4 = vpop.f32.mrb[93].mxu1  ;;  %3909 = vmatprep.subr.bf16.mxu0 %v4059_v59 }
 0x249   : > { %v1159_v5 = vadd.f32 %v4476_v48, %v1158_v4  ;;  %v3734_v6 = vpop.f32.mrb[94].mxu1  ;;  %3807 = vmatprep.mubr.bf16.mxu0 %v1265_v1 }
 0x24a   : > { %v1170_v7 = vadd.f32 %v3734_v6, %v4476_v48  ;;  %v1161_v8 = vpop.f32.mrb[95].mxu1  ;;  %3808 = vmatmul.mubr.bf16.gmra.mrb[88].mxu0 %v1266_v0  ;;  %v1235_v10 = vmax.f32 %v1167_v3, 0.0 }
 0x24b   : > { %v1162_v9 = vadd.f32 %v4476_v48, %v1161_v8  ;;  %v1233_v15 = vmax.f32 %v1159_v5, 0.0  ;;  %v4569_v48 = vld [vmem:[%s4883_s3 + $0x2] ss:$0 sm:$0xff]  ;;  %3910 = vmatpush3.bf16.msra.mxu0 %v4059_v59 }
 0x24c   : > { %v1236_v12 = vmax.f32 %v1170_v7, 0.0 }
 0x24d   : > { %v1234_v18 = vmax.f32 %v1162_v9, 0.0 }
 0x24e   : > { %v1268_v19 = vpack.c.bf16 %v1236_v12, %v1235_v10 }
 0x24f   : > { %v1267_v21 = vpack.c.bf16 %v1234_v18, %v1233_v15 }
 0x251   : > { %3811 = vmatprep.mubr.bf16.mxu0 %v1267_v21 }
 0x252   : > { %3812 = vmatmul.mubr.bf16.gmra.mrb[92].mxu0 %v1268_v19 }
 0x2ad   : > { %v3753_v24 = vpop.f32.mrb[32].mxu0 }
 0x2ae   : > { %v1382_v25 = vadd.f32 %v3753_v24, %v4569_v48  ;;  %v1373_v26 = vpop.f32.mrb[33].mxu0 }
 0x2af   : > { %v1374_v27 = vadd.f32 %v4569_v48, %v1373_v26  ;;  %v3754_v28 = vpop.f32.mrb[34].mxu0 }
 0x2b0   : > { %v1385_v29 = vadd.f32 %v3754_v28, %v4569_v48  ;;  %v1376_v30 = vpop.f32.mrb[35].mxu0  ;;  %v1630_v34 = vmax.f32 %v1382_v25, 0.0 }
 0x2b1   : > { %v1377_v33 = vadd.f32 %v4569_v48, %v1376_v30  ;;  %v1628_v36 = vmax.f32 %v1374_v27, 0.0 }
 0x2b2   : > { %v1631_v35 = vmax.f32 %v1385_v29, 0.0 }
 0x2b3   : > { %v1629_v37 = vmax.f32 %v1377_v33, 0.0 }
 0x2b4   : > { %v1693_v38 = vpack.c.bf16 %v1631_v35, %v1630_v34 }
 0x2b5   : > { %v1692_v40 = vpack.c.bf16 %v1629_v37, %v1628_v36  ;;  %v3757_v44 = vpop.f32.mrb[36].mxu0 }
 0x2b6   : > { %v1398_v17 = vadd.f32 %v3757_v44, %v4569_v48  ;;  %v1389_v20 = vpop.f32.mrb[37].mxu0 }
 0x2b7   : > { %v1390_v51 = vadd.f32 %v4569_v48, %v1389_v20  ;;  %v3758_v14 = vpop.f32.mrb[38].mxu0  ;;  %3831 = vmatprep.mubr.bf16.mxu1 %v1692_v40 }
 0x2b8   : > { %v1401_v16 = vadd.f32 %v3758_v14, %v4569_v48  ;;  %v1392_v45 = vpop.f32.mrb[39].mxu0  ;;  %3832 = vmatmul.mubr.bf16.vlgmr.msra.gmra.mrb[96].mxu1 %v1693_v38  ;;  %v1634_v13 = vmax.f32 %v1398_v17, 0.0 }
 0x2b9   : > { %v1393_v11 = vadd.f32 %v4569_v48, %v1392_v45  ;;  %v1632_v42 = vmax.f32 %v1390_v51, 0.0 }
 0x2ba   : > { %v1635_v41 = vmax.f32 %v1401_v16, 0.0 }
 0x2bb   : > { %v1633_v43 = vmax.f32 %v1393_v11, 0.0 }
 0x2bc   : > { %v1695_v46 = vpack.c.bf16 %v1635_v41, %v1634_v13 }
 0x2bd   : > { %v1694_v50 = vpack.c.bf16 %v1633_v43, %v1632_v42  ;;  %v3761_v52 = vpop.f32.mrb[40].mxu0 }
 0x2be   : > { %v1414_v53 = vadd.f32 %v3761_v52, %v4569_v48  ;;  %v1405_v54 = vpop.f32.mrb[41].mxu0 }
 0x2bf   : > { %v1406_v55 = vadd.f32 %v4569_v48, %v1405_v54  ;;  %v3762_v56 = vpop.f32.mrb[42].mxu0  ;;  %3835 = vmatprep.mubr.bf16.mxu1 %v1694_v50 }
 0x2c0   : > { %v1417_v57 = vadd.f32 %v3762_v56, %v4569_v48  ;;  %v1408_v58 = vpop.f32.mrb[43].mxu0  ;;  %3836 = vmatmul.mubr.bf16.gmra.mrb[100].mxu1 %v1695_v46  ;;  %v1638_v61 = vmax.f32 %v1414_v53, 0.0 }
 0x2c1   : > { %v1409_v60 = vadd.f32 %v4569_v48, %v1408_v58  ;;  %v1636_v63 = vmax.f32 %v1406_v55, 0.0 }
 0x2c2   : > { %v1639_v62 = vmax.f32 %v1417_v57, 0.0 }
 0x2c3   : > { %v1637_v0 = vmax.f32 %v1409_v60, 0.0 }
 0x2c4   : > { %v1697_v1 = vpack.c.bf16 %v1639_v62, %v1638_v61 }
 0x2c5   : > { %v1696_v2 = vpack.c.bf16 %v1637_v0, %v1636_v63  ;;  %v3765_v3 = vpop.f32.mrb[44].mxu0 }
 0x2c6   : > { %v1430_v4 = vadd.f32 %v3765_v3, %v4569_v48  ;;  %v1421_v5 = vpop.f32.mrb[45].mxu0 }
 0x2c7   : > { %v1422_v6 = vadd.f32 %v4569_v48, %v1421_v5  ;;  %v3766_v7 = vpop.f32.mrb[46].mxu0  ;;  %3839 = vmatprep.mubr.bf16.mxu1 %v1696_v2 }
 0x2c8   : > { %v1433_v8 = vadd.f32 %v3766_v7, %v4569_v48  ;;  %v1424_v9 = vpop.f32.mrb[47].mxu0  ;;  %3840 = vmatmul.mubr.bf16.gmra.mrb[104].mxu1 %v1697_v1  ;;  %v1642_v12 = vmax.f32 %v1430_v4, 0.0 }
 0x2c9   : > { %v1425_v10 = vadd.f32 %v4569_v48, %v1424_v9  ;;  %v1640_v18 = vmax.f32 %v1422_v6, 0.0 }
 0x2ca   : > { %v1643_v15 = vmax.f32 %v1433_v8, 0.0 }
 0x2cb   : > { %v1641_v19 = vmax.f32 %v1425_v10, 0.0 }
 0x2cc   : > { %v1699_v21 = vpack.c.bf16 %v1643_v15, %v1642_v12 }
 0x2cd   : > { %v1698_v22 = vpack.c.bf16 %v1641_v19, %v1640_v18  ;;  %v3769_v23 = vpop.f32.mrb[48].mxu0 }
 0x2ce   : > { %v1446_v24 = vadd.f32 %v3769_v23, %v4569_v48  ;;  %v1437_v25 = vpop.f32.mrb[49].mxu0 }
 0x2cf   : > { %v1438_v26 = vadd.f32 %v4569_v48, %v1437_v25  ;;  %v3770_v27 = vpop.f32.mrb[50].mxu0  ;;  %3843 = vmatprep.mubr.bf16.mxu1 %v1698_v22 }
 0x2d0   : > { %v1449_v28 = vadd.f32 %v3770_v27, %v4569_v48  ;;  %v1440_v29 = vpop.f32.mrb[51].mxu0  ;;  %3844 = vmatmul.mubr.bf16.gmra.mrb[108].mxu1 %v1699_v21  ;;  %v1646_v31 = vmax.f32 %v1446_v24, 0.0 }
 0x2d1   : > { %v1441_v30 = vadd.f32 %v4569_v48, %v1440_v29  ;;  %v1644_v33 = vmax.f32 %v1438_v26, 0.0 }
 0x2d2   : > { %v1647_v32 = vmax.f32 %v1449_v28, 0.0 }
 0x2d3   : > { %v1645_v34 = vmax.f32 %v1441_v30, 0.0 }
 0x2d4   : > { %v1701_v35 = vpack.c.bf16 %v1647_v32, %v1646_v31 }
 0x2d5   : > { %v1700_v36 = vpack.c.bf16 %v1645_v34, %v1644_v33  ;;  %v3773_v37 = vpop.f32.mrb[52].mxu0 }
 0x2d6   : > { %v1462_v38 = vadd.f32 %v3773_v37, %v4569_v48  ;;  %v1453_v39 = vpop.f32.mrb[53].mxu0 }
 0x2d7   : > { %v1454_v40 = vadd.f32 %v4569_v48, %v1453_v39  ;;  %v3774_v44 = vpop.f32.mrb[54].mxu0  ;;  %3847 = vmatprep.mubr.bf16.mxu1 %v1700_v36 }
 0x2d8   : > { %v1465_v17 = vadd.f32 %v3774_v44, %v4569_v48  ;;  %v1456_v20 = vpop.f32.mrb[55].mxu0  ;;  %3848 = vmatmul.mubr.bf16.gmra.mrb[112].mxu1 %v1701_v35  ;;  %v1650_v14 = vmax.f32 %v1462_v38, 0.0 }
 0x2d9   : > { %v1457_v51 = vadd.f32 %v4569_v48, %v1456_v20  ;;  %v1648_v45 = vmax.f32 %v1454_v40, 0.0 }
 0x2da   : > { %v1651_v16 = vmax.f32 %v1465_v17, 0.0 }
 0x2db   : > { %v1649_v47 = vmax.f32 %v1457_v51, 0.0 }
 0x2dc   : > { %v1703_v11 = vpack.c.bf16 %v1651_v16, %v1650_v14 }
 0x2dd   : > { %v1702_v13 = vpack.c.bf16 %v1649_v47, %v1648_v45  ;;  %v3777_v41 = vpop.f32.mrb[56].mxu0 }
 0x2de   : > { %v1478_v42 = vadd.f32 %v3777_v41, %v4569_v48  ;;  %v1469_v43 = vpop.f32.mrb[57].mxu0 }
 0x2df   : > { %v1470_v46 = vadd.f32 %v4569_v48, %v1469_v43  ;;  %v3778_v49 = vpop.f32.mrb[58].mxu0  ;;  %3851 = vmatprep.mubr.bf16.mxu1 %v1702_v13 }
 0x2e0   : > { %v1481_v50 = vadd.f32 %v3778_v49, %v4569_v48  ;;  %v1472_v52 = vpop.f32.mrb[59].mxu0  ;;  %3852 = vmatmul.mubr.bf16.gmra.mrb[116].mxu1 %v1703_v11  ;;  %v1654_v54 = vmax.f32 %v1478_v42, 0.0 }
 0x2e1   : > { %v1473_v53 = vadd.f32 %v4569_v48, %v1472_v52  ;;  %v1652_v56 = vmax.f32 %v1470_v46, 0.0 }
 0x2e2   : > { %v1655_v55 = vmax.f32 %v1481_v50, 0.0 }
 0x2e3   : > { %v1653_v57 = vmax.f32 %v1473_v53, 0.0 }
 0x2e4   : > { %v1705_v58 = vpack.c.bf16 %v1655_v55, %v1654_v54 }
 0x2e5   : > { %v1704_v59 = vpack.c.bf16 %v1653_v57, %v1652_v56  ;;  %v3781_v60 = vpop.f32.mrb[60].mxu0 }
 0x2e6   : > { %v1494_v61 = vadd.f32 %v3781_v60, %v4569_v48  ;;  %v1485_v62 = vpop.f32.mrb[61].mxu0 }
 0x2e7   : > { %v1486_v63 = vadd.f32 %v4569_v48, %v1485_v62  ;;  %v3782_v0 = vpop.f32.mrb[62].mxu0  ;;  %3855 = vmatprep.mubr.bf16.mxu1 %v1704_v59 }
 0x2e8   : > { %v1497_v1 = vadd.f32 %v3782_v0, %v4569_v48  ;;  %v1488_v2 = vpop.f32.mrb[63].mxu0  ;;  %3856 = vmatmul.mubr.bf16.gmra.mrb[120].mxu1 %v1705_v58  ;;  %v1658_v4 = vmax.f32 %v1494_v61, 0.0 }
 0x2e9   : > { %v1489_v3 = vadd.f32 %v4569_v48, %v1488_v2  ;;  %v1656_v6 = vmax.f32 %v1486_v63, 0.0 }
 0x2ea   : > { %v1659_v5 = vmax.f32 %v1497_v1, 0.0 }
 0x2eb   : > { %v1657_v7 = vmax.f32 %v1489_v3, 0.0 }
 0x2ec   : > { %v1707_v8 = vpack.c.bf16 %v1659_v5, %v1658_v4 }
 0x2ed   : > { %v1706_v9 = vpack.c.bf16 %v1657_v7, %v1656_v6  ;;  %v3785_v10 = vpop.f32.mrb[64].mxu0 }
 0x2ee   : > { %v1510_v12 = vadd.f32 %v3785_v10, %v4569_v48  ;;  %v1501_v15 = vpop.f32.mrb[65].mxu0 }
 0x2ef   : > { %v1502_v18 = vadd.f32 %v4569_v48, %v1501_v15  ;;  %v3786_v19 = vpop.f32.mrb[66].mxu0  ;;  %3859 = vmatprep.mubr.bf16.mxu1 %v1706_v9 }
 0x2f0   : > { %v1513_v21 = vadd.f32 %v3786_v19, %v4569_v48  ;;  %v1504_v22 = vpop.f32.mrb[67].mxu0  ;;  %3860 = vmatmul.mubr.bf16.gmra.mrb[124].mxu1 %v1707_v8  ;;  %v1662_v24 = vmax.f32 %v1510_v12, 0.0 }
 0x2f1   : > { %v1505_v23 = vadd.f32 %v4569_v48, %v1504_v22  ;;  %v1660_v26 = vmax.f32 %v1502_v18, 0.0 }
 0x2f2   : > { %v1663_v25 = vmax.f32 %v1513_v21, 0.0 }
 0x2f3   : > { %v1661_v27 = vmax.f32 %v1505_v23, 0.0 }
 0x2f4   : > { %v1709_v28 = vpack.c.bf16 %v1663_v25, %v1662_v24 }
 0x2f5   : > { %v1708_v29 = vpack.c.bf16 %v1661_v27, %v1660_v26  ;;  %v3789_v30 = vpop.f32.mrb[68].mxu0 }
 0x2f6   : > { %v1526_v31 = vadd.f32 %v3789_v30, %v4569_v48  ;;  %v1517_v32 = vpop.f32.mrb[69].mxu0 }
 0x2f7   : > { %v1518_v33 = vadd.f32 %v4569_v48, %v1517_v32  ;;  %v3790_v34 = vpop.f32.mrb[70].mxu0  ;;  %3863 = vmatprep.mubr.bf16.mxu1 %v1708_v29 }
 0x2f8   : > { %v1529_v35 = vadd.f32 %v3790_v34, %v4569_v48  ;;  %v1520_v36 = vpop.f32.mrb[71].mxu0  ;;  %3864 = vmatmul.mubr.bf16.gmra.mrb[128].mxu1 %v1709_v28  ;;  %v1666_v38 = vmax.f32 %v1526_v31, 0.0 }
 0x2f9   : > { %v1521_v37 = vadd.f32 %v4569_v48, %v1520_v36  ;;  %v1664_v40 = vmax.f32 %v1518_v33, 0.0 }
 0x2fa   : > { %v1667_v39 = vmax.f32 %v1529_v35, 0.0 }
 0x2fb   : > { %v1665_v44 = vmax.f32 %v1521_v37, 0.0 }
 0x2fc   : > { %v1711_v17 = vpack.c.bf16 %v1667_v39, %v1666_v38 }
 0x2fd   : > { %v1710_v20 = vpack.c.bf16 %v1665_v44, %v1664_v40  ;;  %v3793_v51 = vpop.f32.mrb[72].mxu0 }
 0x2fe   : > { %v1542_v14 = vadd.f32 %v3793_v51, %v4569_v48  ;;  %v1533_v16 = vpop.f32.mrb[73].mxu0 }
 0x2ff   : > { %v1534_v45 = vadd.f32 %v4569_v48, %v1533_v16  ;;  %v3794_v47 = vpop.f32.mrb[74].mxu0  ;;  %3867 = vmatprep.mubr.bf16.mxu1 %v1710_v20 }
 0x300   : > { %v1545_v11 = vadd.f32 %v3794_v47, %v4569_v48  ;;  %v1536_v13 = vpop.f32.mrb[75].mxu0  ;;  %3868 = vmatmul.mubr.bf16.gmra.mrb[132].mxu1 %v1711_v17  ;;  %v1670_v42 = vmax.f32 %v1542_v14, 0.0 }
 0x301   : > { %v1537_v41 = vadd.f32 %v4569_v48, %v1536_v13  ;;  %v1668_v46 = vmax.f32 %v1534_v45, 0.0 }
 0x302   : > { %v1671_v43 = vmax.f32 %v1545_v11, 0.0 }
 0x303   : > { %v1669_v49 = vmax.f32 %v1537_v41, 0.0 }
 0x304   : > { %v1713_v50 = vpack.c.bf16 %v1671_v43, %v1670_v42 }
 0x305   : > { %v1712_v52 = vpack.c.bf16 %v1669_v49, %v1668_v46  ;;  %v3797_v53 = vpop.f32.mrb[76].mxu0 }
 0x306   : > { %v1558_v54 = vadd.f32 %v3797_v53, %v4569_v48  ;;  %v1549_v55 = vpop.f32.mrb[77].mxu0 }
 0x307   : > { %v1550_v56 = vadd.f32 %v4569_v48, %v1549_v55  ;;  %v3798_v57 = vpop.f32.mrb[78].mxu0  ;;  %3871 = vmatprep.mubr.bf16.mxu1 %v1712_v52 }
 0x308   : > { %v1561_v58 = vadd.f32 %v3798_v57, %v4569_v48  ;;  %v1552_v59 = vpop.f32.mrb[79].mxu0  ;;  %3872 = vmatmul.mubr.bf16.gmra.mrb[136].mxu1 %v1713_v50  ;;  %v1674_v61 = vmax.f32 %v1558_v54, 0.0 }
 0x309   : > { %v1553_v60 = vadd.f32 %v4569_v48, %v1552_v59  ;;  %v1672_v63 = vmax.f32 %v1550_v56, 0.0 }
 0x30a   : > { %v1675_v62 = vmax.f32 %v1561_v58, 0.0 }
 0x30b   : > { %v1673_v0 = vmax.f32 %v1553_v60, 0.0  ;;  %v4656_v60 = vld [vmem:[%s4883_s3 + $0x3] ss:$0 sm:$0xff] }
 0x30c   : > { %v1715_v1 = vpack.c.bf16 %v1675_v62, %v1674_v61 }
 0x30d   : > { %v1714_v2 = vpack.c.bf16 %v1673_v0, %v1672_v63  ;;  %v3801_v3 = vpop.f32.mrb[80].mxu0 }
 0x30e   : > { %v1574_v4 = vadd.f32 %v3801_v3, %v4569_v48  ;;  %v1565_v5 = vpop.f32.mrb[81].mxu0 }
 0x30f   : > { %v1566_v6 = vadd.f32 %v4569_v48, %v1565_v5  ;;  %v3802_v7 = vpop.f32.mrb[82].mxu0  ;;  %3875 = vmatprep.mubr.bf16.mxu1 %v1714_v2 }
 0x310   : > { %v1577_v8 = vadd.f32 %v3802_v7, %v4569_v48  ;;  %v1568_v9 = vpop.f32.mrb[83].mxu0  ;;  %3876 = vmatmul.mubr.bf16.gmra.mrb[140].mxu1 %v1715_v1  ;;  %v1678_v12 = vmax.f32 %v1574_v4, 0.0 }
 0x311   : > { %v1569_v10 = vadd.f32 %v4569_v48, %v1568_v9  ;;  %v1676_v18 = vmax.f32 %v1566_v6, 0.0 }
 0x312   : > { %v1679_v15 = vmax.f32 %v1577_v8, 0.0 }
 0x313   : > { %v1677_v19 = vmax.f32 %v1569_v10, 0.0 }
 0x314   : > { %v1717_v21 = vpack.c.bf16 %v1679_v15, %v1678_v12 }
 0x315   : > { %v1716_v22 = vpack.c.bf16 %v1677_v19, %v1676_v18  ;;  %v3805_v23 = vpop.f32.mrb[84].mxu0 }
 0x316   : > { %v1590_v24 = vadd.f32 %v3805_v23, %v4569_v48  ;;  %v1581_v25 = vpop.f32.mrb[85].mxu0 }
 0x317   : > { %v1582_v26 = vadd.f32 %v4569_v48, %v1581_v25  ;;  %v3806_v27 = vpop.f32.mrb[86].mxu0  ;;  %3879 = vmatprep.mubr.bf16.mxu1 %v1716_v22 }
 0x318   : > { %v1593_v28 = vadd.f32 %v3806_v27, %v4569_v48  ;;  %v1584_v29 = vpop.f32.mrb[87].mxu0  ;;  %3880 = vmatmul.mubr.bf16.gmra.mrb[144].mxu1 %v1717_v21  ;;  %v1682_v31 = vmax.f32 %v1590_v24, 0.0 }
 0x319   : > { %v1585_v30 = vadd.f32 %v4569_v48, %v1584_v29  ;;  %v1680_v33 = vmax.f32 %v1582_v26, 0.0 }
 0x31a   : > { %v1683_v32 = vmax.f32 %v1593_v28, 0.0 }
 0x31b   : > { %v1681_v34 = vmax.f32 %v1585_v30, 0.0 }
 0x31c   : > { %v1719_v35 = vpack.c.bf16 %v1683_v32, %v1682_v31 }
 0x31d   : > { %v1718_v36 = vpack.c.bf16 %v1681_v34, %v1680_v33  ;;  %v3809_v37 = vpop.f32.mrb[88].mxu0 }
 0x31e   : > { %v1606_v38 = vadd.f32 %v3809_v37, %v4569_v48  ;;  %v1597_v39 = vpop.f32.mrb[89].mxu0 }
 0x31f   : > { %v1598_v40 = vadd.f32 %v4569_v48, %v1597_v39  ;;  %v3810_v44 = vpop.f32.mrb[90].mxu0  ;;  %3883 = vmatprep.mubr.bf16.mxu1 %v1718_v36 }
 0x320   : > { %v1609_v17 = vadd.f32 %v3810_v44, %v4569_v48  ;;  %v1600_v20 = vpop.f32.mrb[91].mxu0  ;;  %3884 = vmatmul.mubr.bf16.gmra.mrb[148].mxu1 %v1719_v35  ;;  %v1686_v14 = vmax.f32 %v1606_v38, 0.0 }
 0x321   : > { %v1601_v51 = vadd.f32 %v4569_v48, %v1600_v20  ;;  %v1684_v45 = vmax.f32 %v1598_v40, 0.0 }
 0x322   : > { %v1687_v16 = vmax.f32 %v1609_v17, 0.0 }
 0x323   : > { %v1685_v47 = vmax.f32 %v1601_v51, 0.0 }
 0x324   : > { %v1721_v11 = vpack.c.bf16 %v1687_v16, %v1686_v14 }
 0x325   : > { %v1720_v13 = vpack.c.bf16 %v1685_v47, %v1684_v45  ;;  %v3813_v41 = vpop.f32.mrb[92].mxu0 }
 0x326   : > { %v1622_v42 = vadd.f32 %v3813_v41, %v4569_v48  ;;  %v1613_v43 = vpop.f32.mrb[93].mxu0 }
 0x327   : > { %v1614_v46 = vadd.f32 %v4569_v48, %v1613_v43  ;;  %v3814_v49 = vpop.f32.mrb[94].mxu0  ;;  %3887 = vmatprep.mubr.bf16.mxu1 %v1720_v13 }
 0x328   : > { %v1625_v50 = vadd.f32 %v3814_v49, %v4569_v48  ;;  %v1616_v52 = vpop.f32.mrb[95].mxu0  ;;  %3888 = vmatmul.mubr.bf16.gmra.mrb[152].mxu1 %v1721_v11  ;;  %v1690_v54 = vmax.f32 %v1622_v42, 0.0 }
 0x329   : > { %v1617_v53 = vadd.f32 %v4569_v48, %v1616_v52  ;;  %v1688_v56 = vmax.f32 %v1614_v46, 0.0 }
 0x32a   : > { %v1691_v55 = vmax.f32 %v1625_v50, 0.0 }
 0x32b   : > { %v1689_v57 = vmax.f32 %v1617_v53, 0.0 }
 0x32c   : > { %v1723_v58 = vpack.c.bf16 %v1691_v55, %v1690_v54 }
 0x32d   : > { %v1722_v59 = vpack.c.bf16 %v1689_v57, %v1688_v56 }
 0x32f   : > { %3891 = vmatprep.mubr.bf16.mxu1 %v1722_v59 }
 0x330   : > { %3892 = vmatmul.mubr.bf16.gmra.mrb[156].mxu1 %v1723_v58 }
 0x38b   : > { %v3833_v61 = vpop.f32.mrb[96].mxu1 }
 0x38c   : > { %v1837_v62 = vadd.f32 %v3833_v61, %v4656_v60  ;;  %v1828_v63 = vpop.f32.mrb[97].mxu1 }
 0x38d   : > { %v1829_v0 = vadd.f32 %v4656_v60, %v1828_v63  ;;  %v3834_v48 = vpop.f32.mrb[98].mxu1 }
 0x38e   : > { %v1840_v1 = vadd.f32 %v3834_v48, %v4656_v60  ;;  %v1831_v2 = vpop.f32.mrb[99].mxu1  ;;  %v2085_v4 = vmax.f32 %v1837_v62, 0.0 }
 0x38f   : > { %v1832_v3 = vadd.f32 %v4656_v60, %v1831_v2  ;;  %v2083_v6 = vmax.f32 %v1829_v0, 0.0 }
 0x390   : > { %v2086_v5 = vmax.f32 %v1840_v1, 0.0 }
 0x391   : > { %v2084_v7 = vmax.f32 %v1832_v3, 0.0 }
 0x392   : > { %v2148_v8 = vpack.c.bf16 %v2086_v5, %v2085_v4 }
 0x393   : > { %v2147_v9 = vpack.c.bf16 %v2084_v7, %v2083_v6  ;;  %v3837_v10 = vpop.f32.mrb[100].mxu1 }
 0x394   : > { %v1853_v12 = vadd.f32 %v3837_v10, %v4656_v60  ;;  %v1844_v15 = vpop.f32.mrb[101].mxu1 }
 0x395   : > { %v1845_v18 = vadd.f32 %v4656_v60, %v1844_v15  ;;  %v3838_v19 = vpop.f32.mrb[102].mxu1  ;;  %3911 = vmatprep.mubr.bf16.mxu0 %v2147_v9 }
 0x396   : > { %v1856_v21 = vadd.f32 %v3838_v19, %v4656_v60  ;;  %v1847_v22 = vpop.f32.mrb[103].mxu1  ;;  %3912 = vmatmul.mubr.bf16.vlgmr.msra.gmra.mrb[96].mxu0 %v2148_v8  ;;  %v2089_v24 = vmax.f32 %v1853_v12, 0.0 }
 0x397   : > { %v1848_v23 = vadd.f32 %v4656_v60, %v1847_v22  ;;  %v2087_v26 = vmax.f32 %v1845_v18, 0.0 }
 0x398   : > { %v2090_v25 = vmax.f32 %v1856_v21, 0.0 }
 0x399   : > { %v2088_v27 = vmax.f32 %v1848_v23, 0.0 }
 0x39a   : > { %v2150_v28 = vpack.c.bf16 %v2090_v25, %v2089_v24 }
 0x39b   : > { %v2149_v29 = vpack.c.bf16 %v2088_v27, %v2087_v26  ;;  %v3841_v30 = vpop.f32.mrb[104].mxu1 }
 0x39c   : > { %v1869_v31 = vadd.f32 %v3841_v30, %v4656_v60  ;;  %v1860_v32 = vpop.f32.mrb[105].mxu1 }
 0x39d   : > { %v1861_v33 = vadd.f32 %v4656_v60, %v1860_v32  ;;  %v3842_v34 = vpop.f32.mrb[106].mxu1  ;;  %3915 = vmatprep.mubr.bf16.mxu0 %v2149_v29 }
 0x39e   : > { %v1872_v35 = vadd.f32 %v3842_v34, %v4656_v60  ;;  %v1863_v36 = vpop.f32.mrb[107].mxu1  ;;  %3916 = vmatmul.mubr.bf16.gmra.mrb[100].mxu0 %v2150_v28  ;;  %v2093_v38 = vmax.f32 %v1869_v31, 0.0 }
 0x39f   : > { %v1864_v37 = vadd.f32 %v4656_v60, %v1863_v36  ;;  %v2091_v40 = vmax.f32 %v1861_v33, 0.0 }
 0x3a0   : > { %v2094_v39 = vmax.f32 %v1872_v35, 0.0 }
 0x3a1   : > { %v2092_v44 = vmax.f32 %v1864_v37, 0.0 }
 0x3a2   : > { %v2152_v17 = vpack.c.bf16 %v2094_v39, %v2093_v38 }
 0x3a3   : > { %v2151_v20 = vpack.c.bf16 %v2092_v44, %v2091_v40  ;;  %v3845_v51 = vpop.f32.mrb[108].mxu1 }
 0x3a4   : > { %v1885_v14 = vadd.f32 %v3845_v51, %v4656_v60  ;;  %v1876_v16 = vpop.f32.mrb[109].mxu1 }
 0x3a5   : > { %v1877_v45 = vadd.f32 %v4656_v60, %v1876_v16  ;;  %v3846_v47 = vpop.f32.mrb[110].mxu1  ;;  %3919 = vmatprep.mubr.bf16.mxu0 %v2151_v20 }
 0x3a6   : > { %v1888_v11 = vadd.f32 %v3846_v47, %v4656_v60  ;;  %v1879_v13 = vpop.f32.mrb[111].mxu1  ;;  %3920 = vmatmul.mubr.bf16.gmra.mrb[104].mxu0 %v2152_v17  ;;  %v2097_v42 = vmax.f32 %v1885_v14, 0.0 }
 0x3a7   : > { %v1880_v41 = vadd.f32 %v4656_v60, %v1879_v13  ;;  %v2095_v46 = vmax.f32 %v1877_v45, 0.0 }
 0x3a8   : > { %v2098_v43 = vmax.f32 %v1888_v11, 0.0 }
 0x3a9   : > { %v2096_v49 = vmax.f32 %v1880_v41, 0.0 }
 0x3aa   : > { %v2154_v50 = vpack.c.bf16 %v2098_v43, %v2097_v42 }
 0x3ab   : > { %v2153_v52 = vpack.c.bf16 %v2096_v49, %v2095_v46  ;;  %v3849_v53 = vpop.f32.mrb[112].mxu1 }
 0x3ac   : > { %v1901_v54 = vadd.f32 %v3849_v53, %v4656_v60  ;;  %v1892_v55 = vpop.f32.mrb[113].mxu1 }
 0x3ad   : > { %v1893_v56 = vadd.f32 %v4656_v60, %v1892_v55  ;;  %v3850_v57 = vpop.f32.mrb[114].mxu1  ;;  %3923 = vmatprep.mubr.bf16.mxu0 %v2153_v52 }
 0x3ae   : > { %v1904_v58 = vadd.f32 %v3850_v57, %v4656_v60  ;;  %v1895_v59 = vpop.f32.mrb[115].mxu1  ;;  %3924 = vmatmul.mubr.bf16.gmra.mrb[108].mxu0 %v2154_v50  ;;  %v2101_v62 = vmax.f32 %v1901_v54, 0.0 }
 0x3af   : > { %v1896_v61 = vadd.f32 %v4656_v60, %v1895_v59  ;;  %v2099_v0 = vmax.f32 %v1893_v56, 0.0 }
 0x3b0   : > { %v2102_v63 = vmax.f32 %v1904_v58, 0.0 }
 0x3b1   : > { %v2100_v48 = vmax.f32 %v1896_v61, 0.0 }
 0x3b2   : > { %v2156_v1 = vpack.c.bf16 %v2102_v63, %v2101_v62 }
 0x3b3   : > { %v2155_v2 = vpack.c.bf16 %v2100_v48, %v2099_v0  ;;  %v3853_v3 = vpop.f32.mrb[116].mxu1 }
 0x3b4   : > { %v1917_v4 = vadd.f32 %v3853_v3, %v4656_v60  ;;  %v1908_v5 = vpop.f32.mrb[117].mxu1 }
 0x3b5   : > { %v1909_v6 = vadd.f32 %v4656_v60, %v1908_v5  ;;  %v3854_v7 = vpop.f32.mrb[118].mxu1  ;;  %3927 = vmatprep.mubr.bf16.mxu0 %v2155_v2 }
 0x3b6   : > { %v1920_v8 = vadd.f32 %v3854_v7, %v4656_v60  ;;  %v1911_v9 = vpop.f32.mrb[119].mxu1  ;;  %3928 = vmatmul.mubr.bf16.gmra.mrb[112].mxu0 %v2156_v1  ;;  %v2105_v12 = vmax.f32 %v1917_v4, 0.0 }
 0x3b7   : > { %v1912_v10 = vadd.f32 %v4656_v60, %v1911_v9  ;;  %v2103_v18 = vmax.f32 %v1909_v6, 0.0 }
 0x3b8   : > { %v2106_v15 = vmax.f32 %v1920_v8, 0.0 }
 0x3b9   : > { %v2104_v19 = vmax.f32 %v1912_v10, 0.0 }
 0x3ba   : > { %v2158_v21 = vpack.c.bf16 %v2106_v15, %v2105_v12 }
 0x3bb   : > { %v2157_v22 = vpack.c.bf16 %v2104_v19, %v2103_v18  ;;  %v3857_v23 = vpop.f32.mrb[120].mxu1 }
 0x3bc   : > { %v1933_v24 = vadd.f32 %v3857_v23, %v4656_v60  ;;  %v1924_v25 = vpop.f32.mrb[121].mxu1 }
 0x3bd   : > { %v1925_v26 = vadd.f32 %v4656_v60, %v1924_v25  ;;  %v3858_v27 = vpop.f32.mrb[122].mxu1  ;;  %3931 = vmatprep.mubr.bf16.mxu0 %v2157_v22 }
 0x3be   : > { %v1936_v28 = vadd.f32 %v3858_v27, %v4656_v60  ;;  %v1927_v29 = vpop.f32.mrb[123].mxu1  ;;  %3932 = vmatmul.mubr.bf16.gmra.mrb[116].mxu0 %v2158_v21  ;;  %v2109_v31 = vmax.f32 %v1933_v24, 0.0 }
 0x3bf   : > { %v1928_v30 = vadd.f32 %v4656_v60, %v1927_v29  ;;  %v2107_v33 = vmax.f32 %v1925_v26, 0.0 }
 0x3c0   : > { %v2110_v32 = vmax.f32 %v1936_v28, 0.0 }
 0x3c1   : > { %v2108_v34 = vmax.f32 %v1928_v30, 0.0 }
 0x3c2   : > { %v2160_v35 = vpack.c.bf16 %v2110_v32, %v2109_v31 }
 0x3c3   : > { %v2159_v36 = vpack.c.bf16 %v2108_v34, %v2107_v33  ;;  %v3861_v37 = vpop.f32.mrb[124].mxu1 }
 0x3c4   : > { %v1949_v38 = vadd.f32 %v3861_v37, %v4656_v60  ;;  %v1940_v39 = vpop.f32.mrb[125].mxu1 }
 0x3c5   : > { %v1941_v40 = vadd.f32 %v4656_v60, %v1940_v39  ;;  %v3862_v44 = vpop.f32.mrb[126].mxu1  ;;  %3935 = vmatprep.mubr.bf16.mxu0 %v2159_v36 }
 0x3c6   : > { %v1952_v17 = vadd.f32 %v3862_v44, %v4656_v60  ;;  %v1943_v20 = vpop.f32.mrb[127].mxu1  ;;  %3936 = vmatmul.mubr.bf16.gmra.mrb[120].mxu0 %v2160_v35  ;;  %v2113_v14 = vmax.f32 %v1949_v38, 0.0 }
 0x3c7   : > { %v1944_v51 = vadd.f32 %v4656_v60, %v1943_v20  ;;  %v2111_v45 = vmax.f32 %v1941_v40, 0.0 }
 0x3c8   : > { %v2114_v16 = vmax.f32 %v1952_v17, 0.0 }
 0x3c9   : > { %v2112_v47 = vmax.f32 %v1944_v51, 0.0 }
 0x3ca   : > { %v2162_v11 = vpack.c.bf16 %v2114_v16, %v2113_v14 }
 0x3cb   : > { %v2161_v13 = vpack.c.bf16 %v2112_v47, %v2111_v45  ;;  %v3865_v41 = vpop.f32.mrb[128].mxu1 }
 0x3cc   : > { %v1965_v42 = vadd.f32 %v3865_v41, %v4656_v60  ;;  %v1956_v43 = vpop.f32.mrb[129].mxu1 }
 0x3cd   : > { %v1957_v46 = vadd.f32 %v4656_v60, %v1956_v43  ;;  %v3866_v49 = vpop.f32.mrb[130].mxu1  ;;  %3939 = vmatprep.mubr.bf16.mxu0 %v2161_v13 }
 0x3ce   : > { %v1968_v50 = vadd.f32 %v3866_v49, %v4656_v60  ;;  %v1959_v52 = vpop.f32.mrb[131].mxu1  ;;  %3940 = vmatmul.mubr.bf16.gmra.mrb[124].mxu0 %v2162_v11  ;;  %v2117_v54 = vmax.f32 %v1965_v42, 0.0 }
 0x3cf   : > { %v1960_v53 = vadd.f32 %v4656_v60, %v1959_v52  ;;  %v2115_v56 = vmax.f32 %v1957_v46, 0.0 }
 0x3d0   : > { %v2118_v55 = vmax.f32 %v1968_v50, 0.0 }
 0x3d1   : > { %v2116_v57 = vmax.f32 %v1960_v53, 0.0 }
 0x3d2   : > { %v2164_v58 = vpack.c.bf16 %v2118_v55, %v2117_v54 }
 0x3d3   : > { %v2163_v59 = vpack.c.bf16 %v2116_v57, %v2115_v56  ;;  %v3869_v61 = vpop.f32.mrb[132].mxu1 }
 0x3d4   : > { %v1981_v62 = vadd.f32 %v3869_v61, %v4656_v60  ;;  %v1972_v63 = vpop.f32.mrb[133].mxu1 }
 0x3d5   : > { %v1973_v0 = vadd.f32 %v4656_v60, %v1972_v63  ;;  %v3870_v48 = vpop.f32.mrb[134].mxu1  ;;  %3943 = vmatprep.mubr.bf16.mxu0 %v2163_v59 }
 0x3d6   : > { %v1984_v1 = vadd.f32 %v3870_v48, %v4656_v60  ;;  %v1975_v2 = vpop.f32.mrb[135].mxu1  ;;  %3944 = vmatmul.mubr.bf16.gmra.mrb[128].mxu0 %v2164_v58  ;;  %v2121_v4 = vmax.f32 %v1981_v62, 0.0 }
 0x3d7   : > { %v1976_v3 = vadd.f32 %v4656_v60, %v1975_v2  ;;  %v2119_v6 = vmax.f32 %v1973_v0, 0.0 }
 0x3d8   : > { %v2122_v5 = vmax.f32 %v1984_v1, 0.0 }
 0x3d9   : > { %v2120_v7 = vmax.f32 %v1976_v3, 0.0 }
 0x3da   : > { %v2166_v8 = vpack.c.bf16 %v2122_v5, %v2121_v4 }
 0x3db   : > { %v2165_v9 = vpack.c.bf16 %v2120_v7, %v2119_v6  ;;  %v3873_v10 = vpop.f32.mrb[136].mxu1 }
 0x3dc   : > { %v1997_v12 = vadd.f32 %v3873_v10, %v4656_v60  ;;  %v1988_v15 = vpop.f32.mrb[137].mxu1 }
 0x3dd   : > { %v1989_v18 = vadd.f32 %v4656_v60, %v1988_v15  ;;  %v3874_v19 = vpop.f32.mrb[138].mxu1  ;;  %3947 = vmatprep.mubr.bf16.mxu0 %v2165_v9 }
 0x3de   : > { %v2000_v21 = vadd.f32 %v3874_v19, %v4656_v60  ;;  %v1991_v22 = vpop.f32.mrb[139].mxu1  ;;  %3948 = vmatmul.mubr.bf16.gmra.mrb[132].mxu0 %v2166_v8  ;;  %v2125_v24 = vmax.f32 %v1997_v12, 0.0 }
 0x3df   : > { %v1992_v23 = vadd.f32 %v4656_v60, %v1991_v22  ;;  %v2123_v26 = vmax.f32 %v1989_v18, 0.0 }
 0x3e0   : > { %v2126_v25 = vmax.f32 %v2000_v21, 0.0 }
 0x3e1   : > { %v2124_v27 = vmax.f32 %v1992_v23, 0.0 }
 0x3e2   : > { %v2168_v28 = vpack.c.bf16 %v2126_v25, %v2125_v24 }
 0x3e3   : > { %v2167_v29 = vpack.c.bf16 %v2124_v27, %v2123_v26  ;;  %v3877_v30 = vpop.f32.mrb[140].mxu1 }
 0x3e4   : > { %v2013_v31 = vadd.f32 %v3877_v30, %v4656_v60  ;;  %v2004_v32 = vpop.f32.mrb[141].mxu1 }
 0x3e5   : > { %v2005_v33 = vadd.f32 %v4656_v60, %v2004_v32  ;;  %v3878_v34 = vpop.f32.mrb[142].mxu1  ;;  %3951 = vmatprep.mubr.bf16.mxu0 %v2167_v29 }
 0x3e6   : > { %v2016_v35 = vadd.f32 %v3878_v34, %v4656_v60  ;;  %v2007_v36 = vpop.f32.mrb[143].mxu1  ;;  %3952 = vmatmul.mubr.bf16.gmra.mrb[136].mxu0 %v2168_v28  ;;  %v2129_v38 = vmax.f32 %v2013_v31, 0.0 }
 0x3e7   : > { %v2008_v37 = vadd.f32 %v4656_v60, %v2007_v36  ;;  %v2127_v40 = vmax.f32 %v2005_v33, 0.0 }
 0x3e8   : > { %v2130_v39 = vmax.f32 %v2016_v35, 0.0 }
 0x3e9   : > { %v2128_v44 = vmax.f32 %v2008_v37, 0.0 }
 0x3ea   : > { %v2170_v17 = vpack.c.bf16 %v2130_v39, %v2129_v38  ;;  %v4726_v38 = vld [vmem:[%s4883_s3 + $0x4] ss:$0 sm:$0xff] }
 0x3eb   : > { %v2169_v20 = vpack.c.bf16 %v2128_v44, %v2127_v40  ;;  %v3881_v51 = vpop.f32.mrb[144].mxu1 }
 0x3ec   : > { %v2029_v14 = vadd.f32 %v3881_v51, %v4656_v60  ;;  %v2020_v16 = vpop.f32.mrb[145].mxu1 }
 0x3ed   : > { %v2021_v45 = vadd.f32 %v4656_v60, %v2020_v16  ;;  %v3882_v47 = vpop.f32.mrb[146].mxu1  ;;  %3955 = vmatprep.mubr.bf16.mxu0 %v2169_v20 }
 0x3ee   : > { %v2032_v11 = vadd.f32 %v3882_v47, %v4656_v60  ;;  %v2023_v13 = vpop.f32.mrb[147].mxu1  ;;  %3956 = vmatmul.mubr.bf16.gmra.mrb[140].mxu0 %v2170_v17  ;;  %v2133_v42 = vmax.f32 %v2029_v14, 0.0 }
 0x3ef   : > { %v2024_v41 = vadd.f32 %v4656_v60, %v2023_v13  ;;  %v2131_v46 = vmax.f32 %v2021_v45, 0.0 }
 0x3f0   : > { %v2134_v43 = vmax.f32 %v2032_v11, 0.0 }
 0x3f1   : > { %v2132_v49 = vmax.f32 %v2024_v41, 0.0 }
 0x3f2   : > { %v2172_v50 = vpack.c.bf16 %v2134_v43, %v2133_v42 }
 0x3f3   : > { %v2171_v52 = vpack.c.bf16 %v2132_v49, %v2131_v46  ;;  %v3885_v53 = vpop.f32.mrb[148].mxu1 }
 0x3f4   : > { %v2045_v54 = vadd.f32 %v3885_v53, %v4656_v60  ;;  %v2036_v55 = vpop.f32.mrb[149].mxu1 }
 0x3f5   : > { %v2037_v56 = vadd.f32 %v4656_v60, %v2036_v55  ;;  %v3886_v57 = vpop.f32.mrb[150].mxu1  ;;  %3959 = vmatprep.mubr.bf16.mxu0 %v2171_v52 }
 0x3f6   : > { %v2048_v58 = vadd.f32 %v3886_v57, %v4656_v60  ;;  %v2039_v59 = vpop.f32.mrb[151].mxu1  ;;  %3960 = vmatmul.mubr.bf16.gmra.mrb[144].mxu0 %v2172_v50  ;;  %v2137_v62 = vmax.f32 %v2045_v54, 0.0 }
 0x3f7   : > { %v2040_v61 = vadd.f32 %v4656_v60, %v2039_v59  ;;  %v2135_v0 = vmax.f32 %v2037_v56, 0.0 }
 0x3f8   : > { %v2138_v63 = vmax.f32 %v2048_v58, 0.0 }
 0x3f9   : > { %v2136_v48 = vmax.f32 %v2040_v61, 0.0 }
 0x3fa   : > { %v2174_v1 = vpack.c.bf16 %v2138_v63, %v2137_v62 }
 0x3fb   : > { %v2173_v2 = vpack.c.bf16 %v2136_v48, %v2135_v0  ;;  %v3889_v3 = vpop.f32.mrb[152].mxu1 }
 0x3fc   : > { %v2061_v4 = vadd.f32 %v3889_v3, %v4656_v60  ;;  %v2052_v5 = vpop.f32.mrb[153].mxu1 }
 0x3fd   : > { %v2053_v6 = vadd.f32 %v4656_v60, %v2052_v5  ;;  %v3890_v7 = vpop.f32.mrb[154].mxu1  ;;  %3963 = vmatprep.mubr.bf16.mxu0 %v2173_v2 }
 0x3fe   : > { %v2064_v8 = vadd.f32 %v3890_v7, %v4656_v60  ;;  %v2055_v9 = vpop.f32.mrb[155].mxu1  ;;  %3964 = vmatmul.mubr.bf16.gmra.mrb[148].mxu0 %v2174_v1  ;;  %v2141_v12 = vmax.f32 %v2061_v4, 0.0 }
 0x3ff   : > { %v2056_v10 = vadd.f32 %v4656_v60, %v2055_v9  ;;  %v2139_v18 = vmax.f32 %v2053_v6, 0.0 }
 0x400   : > { %v2142_v15 = vmax.f32 %v2064_v8, 0.0 }
 0x401   : > { %v2140_v19 = vmax.f32 %v2056_v10, 0.0 }
 0x402   : > { %v2176_v21 = vpack.c.bf16 %v2142_v15, %v2141_v12 }
 0x403   : > { %v2175_v22 = vpack.c.bf16 %v2140_v19, %v2139_v18  ;;  %v3893_v23 = vpop.f32.mrb[156].mxu1 }
 0x404   : > { %v2077_v24 = vadd.f32 %v3893_v23, %v4656_v60  ;;  %v2068_v25 = vpop.f32.mrb[157].mxu1 }
 0x405   : > { %v2069_v26 = vadd.f32 %v4656_v60, %v2068_v25  ;;  %v3894_v27 = vpop.f32.mrb[158].mxu1  ;;  %3967 = vmatprep.mubr.bf16.mxu0 %v2175_v22 }
 0x406   : > { %v2080_v28 = vadd.f32 %v3894_v27, %v4656_v60  ;;  %v2071_v29 = vpop.f32.mrb[159].mxu1  ;;  %3968 = vmatmul.mubr.bf16.gmra.mrb[152].mxu0 %v2176_v21  ;;  %v2145_v31 = vmax.f32 %v2077_v24, 0.0 }
 0x407   : > { %v2072_v30 = vadd.f32 %v4656_v60, %v2071_v29  ;;  %v2143_v33 = vmax.f32 %v2069_v26, 0.0 }
 0x408   : > { %v2146_v32 = vmax.f32 %v2080_v28, 0.0 }
 0x409   : > { %v2144_v34 = vmax.f32 %v2072_v30, 0.0 }
 0x40a   : > { %v2178_v35 = vpack.c.bf16 %v2146_v32, %v2145_v31 }
 0x40b   : > { %v2177_v36 = vpack.c.bf16 %v2144_v34, %v2143_v33 }
 0x40d   : > { %3971 = vmatprep.mubr.bf16.mxu0 %v2177_v36 }
 0x40e   : > { %3972 = vmatmul.mubr.bf16.gmra.mrb[156].mxu0 %v2178_v35 }
 0x469   : > { %v3913_v37 = vpop.f32.mrb[96].mxu0 }
 0x46a   : > { %v2283_v39 = vpop.f32.mrb[97].mxu0  ;;  %v2292_v60 = vadd.f32 %v3913_v37, %v4726_v38 }
 0x46b   : > { %v3914_v40 = vpop.f32.mrb[98].mxu0  ;;  %v2284_v20 = vadd.f32 %v4726_v38, %v2283_v39 }
 0x46c   : > { %v2295_v44 = vadd.f32 %v3914_v40, %v4726_v38  ;;  %v2286_v17 = vpop.f32.mrb[99].mxu0 }
 0x46d   : > { %v2287_v51 = vadd.f32 %v4726_v38, %v2286_v17 }
 0x46e   : > { %v3204_v14 = vpack.c.bf16 %v2295_v44, %v2292_v60 }
 0x46f   : > { %v3199_v16 = vpack.c.bf16 %v2287_v51, %v2284_v20 }
 0x470   : > { %3356 = vst [vmem:[%s4734_s5 + $0x8] sm:$0xff] %v3204_v14  }
 0x471   : > { %3200 = vst [vmem:[%s4734_s5] sm:$0xff] %v3199_v16   ;;  %v3917_v45 = vpop.f32.mrb[100].mxu0 }
 0x472   : > { %v2299_v47 = vpop.f32.mrb[101].mxu0  ;;  %v2308_v13 = vadd.f32 %v3917_v45, %v4726_v38 }
 0x473   : > { %v3918_v11 = vpop.f32.mrb[102].mxu0  ;;  %v2300_v43 = vadd.f32 %v4726_v38, %v2299_v47 }
 0x474   : > { %v2311_v41 = vadd.f32 %v3918_v11, %v4726_v38  ;;  %v2302_v42 = vpop.f32.mrb[103].mxu0 }
 0x475   : > { %v2303_v46 = vadd.f32 %v4726_v38, %v2302_v42 }
 0x476   : > { %v3214_v49 = vpack.c.bf16 %v2311_v41, %v2308_v13 }
 0x477   : > { %v3209_v50 = vpack.c.bf16 %v2303_v46, %v2300_v43 }
 0x478   : > { %3358 = vst [vmem:[%s4734_s5 + $0x18] sm:$0xff] %v3214_v49  }
 0x479   : > { %3357 = vst [vmem:[%s4734_s5 + $0x10] sm:$0xff] %v3209_v50   ;;  %v3921_v52 = vpop.f32.mrb[104].mxu0 }
 0x47a   : > { %v2315_v53 = vpop.f32.mrb[105].mxu0  ;;  %v2324_v55 = vadd.f32 %v3921_v52, %v4726_v38 }
 0x47b   : > { %v3922_v54 = vpop.f32.mrb[106].mxu0  ;;  %v2316_v58 = vadd.f32 %v4726_v38, %v2315_v53 }
 0x47c   : > { %v2327_v56 = vadd.f32 %v3922_v54, %v4726_v38  ;;  %v2318_v57 = vpop.f32.mrb[107].mxu0 }
 0x47d   : > { %v2319_v59 = vadd.f32 %v4726_v38, %v2318_v57 }
 0x47e   : > { %v3224_v61 = vpack.c.bf16 %v2327_v56, %v2324_v55 }
 0x47f   : > { %v3219_v62 = vpack.c.bf16 %v2319_v59, %v2316_v58 }
 0x480   : > { %3360 = vst [vmem:[%s4734_s5 + $0x28] sm:$0xff] %v3224_v61  }
 0x481   : > { %3359 = vst [vmem:[%s4734_s5 + $0x20] sm:$0xff] %v3219_v62   ;;  %v3925_v63 = vpop.f32.mrb[108].mxu0 }
 0x482   : > { %v2331_v0 = vpop.f32.mrb[109].mxu0  ;;  %v2340_v1 = vadd.f32 %v3925_v63, %v4726_v38 }
 0x483   : > { %v3926_v48 = vpop.f32.mrb[110].mxu0  ;;  %v2332_v4 = vadd.f32 %v4726_v38, %v2331_v0 }
 0x484   : > { %v2343_v2 = vadd.f32 %v3926_v48, %v4726_v38  ;;  %v2334_v3 = vpop.f32.mrb[111].mxu0 }
 0x485   : > { %v2335_v5 = vadd.f32 %v4726_v38, %v2334_v3 }
 0x486   : > { %v3234_v6 = vpack.c.bf16 %v2343_v2, %v2340_v1 }
 0x487   : > { %v3229_v7 = vpack.c.bf16 %v2335_v5, %v2332_v4 }
 0x488   : > { %3362 = vst [vmem:[%s4734_s5 + $0x38] sm:$0xff] %v3234_v6  }
 0x489   : > { %3361 = vst [vmem:[%s4734_s5 + $0x30] sm:$0xff] %v3229_v7   ;;  %v3929_v8 = vpop.f32.mrb[112].mxu0 }
 0x48a   : > { %v2347_v9 = vpop.f32.mrb[113].mxu0  ;;  %v2356_v12 = vadd.f32 %v3929_v8, %v4726_v38 }
 0x48b   : > { %v3930_v10 = vpop.f32.mrb[114].mxu0  ;;  %v2348_v19 = vadd.f32 %v4726_v38, %v2347_v9 }
 0x48c   : > { %v2359_v15 = vadd.f32 %v3930_v10, %v4726_v38  ;;  %v2350_v18 = vpop.f32.mrb[115].mxu0 }
 0x48d   : > { %v2351_v21 = vadd.f32 %v4726_v38, %v2350_v18 }
 0x48e   : > { %v3244_v22 = vpack.c.bf16 %v2359_v15, %v2356_v12 }
 0x48f   : > { %v3239_v23 = vpack.c.bf16 %v2351_v21, %v2348_v19 }
 0x490   : > { %3364 = vst [vmem:[%s4734_s5 + $0x48] sm:$0xff] %v3244_v22  }
 0x491   : > { %3363 = vst [vmem:[%s4734_s5 + $0x40] sm:$0xff] %v3239_v23   ;;  %v3933_v24 = vpop.f32.mrb[116].mxu0 }
 0x492   : > { %v2363_v25 = vpop.f32.mrb[117].mxu0  ;;  %v2372_v27 = vadd.f32 %v3933_v24, %v4726_v38 }
 0x493   : > { %v3934_v26 = vpop.f32.mrb[118].mxu0  ;;  %v2364_v30 = vadd.f32 %v4726_v38, %v2363_v25 }
 0x494   : > { %v2375_v28 = vadd.f32 %v3934_v26, %v4726_v38  ;;  %v2366_v29 = vpop.f32.mrb[119].mxu0 }
 0x495   : > { %v2367_v31 = vadd.f32 %v4726_v38, %v2366_v29 }
 0x496   : > { %v3254_v32 = vpack.c.bf16 %v2375_v28, %v2372_v27 }
 0x497   : > { %v3249_v33 = vpack.c.bf16 %v2367_v31, %v2364_v30 }
 0x498   : > { %3366 = vst [vmem:[%s4734_s5 + $0x58] sm:$0xff] %v3254_v32  }
 0x499   : > { %3365 = vst [vmem:[%s4734_s5 + $0x50] sm:$0xff] %v3249_v33   ;;  %v3937_v34 = vpop.f32.mrb[120].mxu0 }
 0x49a   : > { %v2379_v35 = vpop.f32.mrb[121].mxu0  ;;  %v2388_v37 = vadd.f32 %v3937_v34, %v4726_v38 }
 0x49b   : > { %v3938_v36 = vpop.f32.mrb[122].mxu0  ;;  %v2380_v60 = vadd.f32 %v4726_v38, %v2379_v35 }
 0x49c   : > { %v2391_v39 = vadd.f32 %v3938_v36, %v4726_v38  ;;  %v2382_v40 = vpop.f32.mrb[123].mxu0 }
 0x49d   : > { %v2383_v44 = vadd.f32 %v4726_v38, %v2382_v40 }
 0x49e   : > { %v3264_v17 = vpack.c.bf16 %v2391_v39, %v2388_v37 }
 0x49f   : > { %v3259_v20 = vpack.c.bf16 %v2383_v44, %v2380_v60 }
 0x4a0   : > { %3368 = vst [vmem:[%s4734_s5 + $0x68] sm:$0xff] %v3264_v17  }
 0x4a1   : > { %3367 = vst [vmem:[%s4734_s5 + $0x60] sm:$0xff] %v3259_v20   ;;  %v3941_v51 = vpop.f32.mrb[124].mxu0 }
 0x4a2   : > { %v2395_v14 = vpop.f32.mrb[125].mxu0  ;;  %v2404_v45 = vadd.f32 %v3941_v51, %v4726_v38 }
 0x4a3   : > { %v3942_v16 = vpop.f32.mrb[126].mxu0  ;;  %v2396_v13 = vadd.f32 %v4726_v38, %v2395_v14 }
 0x4a4   : > { %v2407_v47 = vadd.f32 %v3942_v16, %v4726_v38  ;;  %v2398_v11 = vpop.f32.mrb[127].mxu0 }
 0x4a5   : > { %v2399_v41 = vadd.f32 %v4726_v38, %v2398_v11 }
 0x4a6   : > { %v3274_v42 = vpack.c.bf16 %v2407_v47, %v2404_v45 }
 0x4a7   : > { %v3269_v43 = vpack.c.bf16 %v2399_v41, %v2396_v13 }
 0x4a8   : > { %3370 = vst [vmem:[%s4734_s5 + $0x78] sm:$0xff] %v3274_v42  }
 0x4a9   : > { %3369 = vst [vmem:[%s4734_s5 + $0x70] sm:$0xff] %v3269_v43   ;;  %v3945_v46 = vpop.f32.mrb[128].mxu0 }
 0x4aa   : > { %v2411_v49 = vpop.f32.mrb[129].mxu0  ;;  %v2420_v52 = vadd.f32 %v3945_v46, %v4726_v38 }
 0x4ab   : > { %v3946_v50 = vpop.f32.mrb[130].mxu0  ;;  %v2412_v55 = vadd.f32 %v4726_v38, %v2411_v49 }
 0x4ac   : > { %v2423_v53 = vadd.f32 %v3946_v50, %v4726_v38  ;;  %v2414_v54 = vpop.f32.mrb[131].mxu0 }
 0x4ad   : > { %v2415_v56 = vadd.f32 %v4726_v38, %v2414_v54 }
 0x4ae   : > { %v3284_v57 = vpack.c.bf16 %v2423_v53, %v2420_v52 }
 0x4af   : > { %v3279_v58 = vpack.c.bf16 %v2415_v56, %v2412_v55 }
 0x4b0   : > { %3372 = vst [vmem:[%s4734_s5 + $0x88] sm:$0xff] %v3284_v57  }
 0x4b1   : > { %3371 = vst [vmem:[%s4734_s5 + $0x80] sm:$0xff] %v3279_v58   ;;  %v3949_v59 = vpop.f32.mrb[132].mxu0 }
 0x4b2   : > { %v2427_v61 = vpop.f32.mrb[133].mxu0  ;;  %v2436_v63 = vadd.f32 %v3949_v59, %v4726_v38 }
 0x4b3   : > { %v3950_v62 = vpop.f32.mrb[134].mxu0  ;;  %v2428_v1 = vadd.f32 %v4726_v38, %v2427_v61 }
 0x4b4   : > { %v2439_v0 = vadd.f32 %v3950_v62, %v4726_v38  ;;  %v2430_v48 = vpop.f32.mrb[135].mxu0 }
 0x4b5   : > { %v2431_v2 = vadd.f32 %v4726_v38, %v2430_v48 }
 0x4b6   : > { %v3294_v3 = vpack.c.bf16 %v2439_v0, %v2436_v63 }
 0x4b7   : > { %v3289_v4 = vpack.c.bf16 %v2431_v2, %v2428_v1 }
 0x4b8   : > { %3374 = vst [vmem:[%s4734_s5 + $0x98] sm:$0xff] %v3294_v3  }
 0x4b9   : > { %3373 = vst [vmem:[%s4734_s5 + $0x90] sm:$0xff] %v3289_v4   ;;  %v3953_v5 = vpop.f32.mrb[136].mxu0 }
 0x4ba   : > { %v2443_v6 = vpop.f32.mrb[137].mxu0  ;;  %v2452_v8 = vadd.f32 %v3953_v5, %v4726_v38 }
 0x4bb   : > { %v3954_v7 = vpop.f32.mrb[138].mxu0  ;;  %v2444_v12 = vadd.f32 %v4726_v38, %v2443_v6 }
 0x4bc   : > { %v2455_v9 = vadd.f32 %v3954_v7, %v4726_v38  ;;  %v2446_v10 = vpop.f32.mrb[139].mxu0 }
 0x4bd   : > { %v2447_v15 = vadd.f32 %v4726_v38, %v2446_v10 }
 0x4be   : > { %v3304_v18 = vpack.c.bf16 %v2455_v9, %v2452_v8 }
 0x4bf   : > { %v3299_v19 = vpack.c.bf16 %v2447_v15, %v2444_v12 }
 0x4c0   : > { %3376 = vst [vmem:[%s4734_s5 + $0xa8] sm:$0xff] %v3304_v18  }
 0x4c1   : > { %3375 = vst [vmem:[%s4734_s5 + $0xa0] sm:$0xff] %v3299_v19   ;;  %v3957_v21 = vpop.f32.mrb[140].mxu0 }
 0x4c2   : > { %v2459_v22 = vpop.f32.mrb[141].mxu0  ;;  %v2468_v24 = vadd.f32 %v3957_v21, %v4726_v38 }
 0x4c3   : > { %v3958_v23 = vpop.f32.mrb[142].mxu0  ;;  %v2460_v27 = vadd.f32 %v4726_v38, %v2459_v22 }
 0x4c4   : > { %v2471_v25 = vadd.f32 %v3958_v23, %v4726_v38  ;;  %v2462_v26 = vpop.f32.mrb[143].mxu0 }
 0x4c5   : > { %v2463_v28 = vadd.f32 %v4726_v38, %v2462_v26 }
 0x4c6   : > { %v3314_v29 = vpack.c.bf16 %v2471_v25, %v2468_v24 }
 0x4c7   : > { %v3309_v30 = vpack.c.bf16 %v2463_v28, %v2460_v27 }
 0x4c8   : > { %3378 = vst [vmem:[%s4734_s5 + $0xb8] sm:$0xff] %v3314_v29  }
 0x4c9   : > { %3377 = vst [vmem:[%s4734_s5 + $0xb0] sm:$0xff] %v3309_v30   ;;  %v3961_v31 = vpop.f32.mrb[144].mxu0 }
 0x4ca   : > { %v2475_v32 = vpop.f32.mrb[145].mxu0  ;;  %v2484_v34 = vadd.f32 %v3961_v31, %v4726_v38 }
 0x4cb   : > { %v3962_v33 = vpop.f32.mrb[146].mxu0  ;;  %v2476_v37 = vadd.f32 %v4726_v38, %v2475_v32 }
 0x4cc   : > { %v2487_v35 = vadd.f32 %v3962_v33, %v4726_v38  ;;  %v2478_v36 = vpop.f32.mrb[147].mxu0 }
 0x4cd   : > { %v2479_v39 = vadd.f32 %v4726_v38, %v2478_v36 }
 0x4ce   : > { %v3324_v40 = vpack.c.bf16 %v2487_v35, %v2484_v34 }
 0x4cf   : > { %v3319_v60 = vpack.c.bf16 %v2479_v39, %v2476_v37 }
 0x4d0   : > { %3380 = vst [vmem:[%s4734_s5 + $0xc8] sm:$0xff] %v3324_v40  }
 0x4d1   : > { %3379 = vst [vmem:[%s4734_s5 + $0xc0] sm:$0xff] %v3319_v60   ;;  %v3965_v44 = vpop.f32.mrb[148].mxu0 }
 0x4d2   : > { %v2491_v17 = vpop.f32.mrb[149].mxu0  ;;  %v2500_v51 = vadd.f32 %v3965_v44, %v4726_v38 }
 0x4d3   : > { %v3966_v20 = vpop.f32.mrb[150].mxu0  ;;  %v2492_v45 = vadd.f32 %v4726_v38, %v2491_v17 }
 0x4d4   : > { %v2503_v14 = vadd.f32 %v3966_v20, %v4726_v38  ;;  %v2494_v16 = vpop.f32.mrb[151].mxu0 }
 0x4d5   : > { %v2495_v47 = vadd.f32 %v4726_v38, %v2494_v16 }
 0x4d6   : > { %v3334_v11 = vpack.c.bf16 %v2503_v14, %v2500_v51 }
 0x4d7   : > { %v3329_v13 = vpack.c.bf16 %v2495_v47, %v2492_v45 }
 0x4d8   : > { %3382 = vst [vmem:[%s4734_s5 + $0xd8] sm:$0xff] %v3334_v11  }
 0x4d9   : > { %3381 = vst [vmem:[%s4734_s5 + $0xd0] sm:$0xff] %v3329_v13   ;;  %v3969_v41 = vpop.f32.mrb[152].mxu0 }
 0x4da   : > { %v2507_v42 = vpop.f32.mrb[153].mxu0  ;;  %v2516_v46 = vadd.f32 %v3969_v41, %v4726_v38 }
 0x4db   : > { %v3970_v43 = vpop.f32.mrb[154].mxu0  ;;  %v2508_v52 = vadd.f32 %v4726_v38, %v2507_v42 }
 0x4dc   : > { %v2519_v49 = vadd.f32 %v3970_v43, %v4726_v38  ;;  %v2510_v50 = vpop.f32.mrb[155].mxu0 }
 0x4dd   : > { %v2511_v53 = vadd.f32 %v4726_v38, %v2510_v50 }
 0x4de   : > { %v3344_v54 = vpack.c.bf16 %v2519_v49, %v2516_v46 }
 0x4df   : > { %v3339_v55 = vpack.c.bf16 %v2511_v53, %v2508_v52 }
 0x4e0   : > { %3384 = vst [vmem:[%s4734_s5 + $0xe8] sm:$0xff] %v3344_v54  }
 0x4e1   : > { %3383 = vst [vmem:[%s4734_s5 + $0xe0] sm:$0xff] %v3339_v55   ;;  %v3973_v56 = vpop.f32.mrb[156].mxu0 }
 0x4e2   : > { %v2523_v57 = vpop.f32.mrb[157].mxu0  ;;  %v2532_v59 = vadd.f32 %v3973_v56, %v4726_v38 }
 0x4e3   : > { %v3974_v58 = vpop.f32.mrb[158].mxu0  ;;  %v2524_v63 = vadd.f32 %v4726_v38, %v2523_v57 }
 0x4e4   : > { %v2535_v61 = vadd.f32 %v3974_v58, %v4726_v38  ;;  %v2526_v62 = vpop.f32.mrb[159].mxu0 }
 0x4e5   : > { %v2527_v0 = vadd.f32 %v4726_v38, %v2526_v62 }
 0x4e6   : > { %v3354_v48 = vpack.c.bf16 %v2535_v61, %v2532_v59 }
 0x4e7   : > { %v3349_v1 = vpack.c.bf16 %v2527_v0, %v2524_v63 }
 0x4e8   : > { %3386 = vst [vmem:[%s4734_s5 + $0xf8] sm:$0xff] %v3354_v48  }
 0x4e9   : > { %3385 = vst [vmem:[%s4734_s5 + $0xf0] sm:$0xff] %v3349_v1  }
 0x4ea   : > { %4073 = shalt.err (!%p4070_p3)
}
 0x4eb   : > { %s4074_s11 = scalar_lea.hbm %s4831_s10, 4096  ;;  %s4078_s27 = scalar_lea.hbm %s4884_s4, 16384 }
 0x4ec   : > { %p4075_p4 = scmp.ne.s32.totalorder %s4831_s10, %s4074_s11  ;;  %p4079_p9 = scmp.lt.u32.totalorder %s4831_s10, %s4884_s4 }
 0x4ed   : > { %p4080_p10 = scmp.lt.u32.totalorder %s4078_s27, %s4074_s11  ;;  %p4082_p12 = scmp.lt.u32.totalorder %s4074_s11, %s4831_s10 }
 0x4ee   : > { %p4076_p7 = pnand %p4075_p4, %p4190_p5 }
 0x4ef   : > { %p4081_p11 = por %p4080_p10, %p4079_p9 }
 0x4f0   : > { %p4077_p8 = pneg %p4076_p7 }
 0x4f1   : > { %p4083_p13 = por %p4082_p12, %p4081_p11 }
 0x4f3   : > { %p4084_p0 = pnand %p4083_p13, %p4077_p8 }
 0x4f5   : > { %4087 = shalt.err (!%p4084_p0)
}
 0x4f6   : > { %s4125_s30 = smov 64   ;;  %s4126_s5 = smov 4  }
 0x4f7   : > { %3983 = dma.vmem_to_hbm [thread:$0]  (%p4190_p5), %s4833_s7, 4096, %s4831_s10, %s4839_s19, %s4125_s30, %s4125_s30, %s4126_s5  }
 0x4f8 PF: > { %p3989_p1 = scmp.ge.s32.totalorder %s4122_s18, 2  ;;  %s2887_s6 = sand.u32 1, %s4110_s15  }
 0x4f9   : > { %s2888_s8 = scalar_lea.sflag [#allocation3], %s2887_s6 }
 0x4fa   : > { %p3986_p2 = pnand %p3989_p1, %p4194_p6 }
 0x4fc   : > { %4105 = dma.done.wait (!%p3986_p2), %s2888_s8, 4096  }
 0x4fd   : > { %4107 = vsyncadd (!%p3986_p2), %s2888_s8, 4294963200  ;;  %p14_p3 = scmp.ge.s32.totalorder %s4177_s21, 6   ;;  %s4887_s15 = smov %s4114_s16 }
 0x4fe   : > { %s4888_s16 = smov %s4118_s17  ;;  %s4889_s17 = smov %s4188_s24 }
 0x4ff   : > { %s4890_s18 = smov %s4177_s21  ;;  %16 = sbr.rel (!%p14_p3) target bundleno = 3 (0x3), region = 74 }
 0x506   :  { %2893 = vsyncpa [#allocation3], 1 }
 0x507   :  { %2895 = vsyncpa [#allocation3 + $0x1], 1 }

</bundles_post_ra>
